<compile_context>
chip_gen: v7x
topology: tpu7x:2x2x1
jax: 0.10.0
libtpu: 0.0.40
codegen_flags: <defaults>
</compile_context>

<pallas_src>
import functools

import jax
import jax.numpy as jnp
import numpy as np
from jax.experimental import pallas as pl
from jax.experimental.pallas import tpu as pltpu


# ---------------------------------------------------------------------------
# Single fused kernel: 2-layer LSTM over all timesteps + final Linear.
# Everything (inputs, weights, states) lives in VMEM; the time recurrence is a
# fully-unrolled static loop (S is small), so there is no grid at all.
# ---------------------------------------------------------------------------
def _fused_lstm_fc_kernel(x_ref, h0_ref, c0_ref,
                          wih1_ref, whh1_ref, b1_ref,
                          w2_ref, b2_ref,
                          fcw_ref, fcb_ref,
                          y_ref, hN_ref, cN_ref,
                          *, seq_len, batch, hidden_size):
    S, B, H = seq_len, batch, hidden_size

    # Initial states (layer 0 and layer 1 of the stacked LSTM).
    h1 = h0_ref[0].astype(jnp.float32)   # (B, H)
    c1 = c0_ref[0].astype(jnp.float32)
    h2 = h0_ref[1].astype(jnp.float32)
    c2 = c0_ref[1].astype(jnp.float32)

    # Hoisted layer-1 input projection for ALL timesteps:
    #   (S*B, F) @ (F, 4H) + (b_ih + b_hh)  ->  (S*B, 4H)
    xg1 = (jnp.dot(x_ref[...], wih1_ref[...],
                   preferred_element_type=jnp.float32)
           + b1_ref[...])

    whh1 = whh1_ref[...]     # (H, 4H)
    w2 = w2_ref[...]         # (2H, 4H)  == vstack(W_ih2^T, W_hh2^T)
    b2 = b2_ref[...]         # (1, 4H)

    def lstm_cell(gates, c_prev):
        # Activations on the full (B, 4H) tile, then slice [i, f, g, o].
        sig = jax.nn.sigmoid(gates)
        th = jnp.tanh(gates)
        i_g = sig[:, 0 * H:1 * H]
        f_g = sig[:, 1 * H:2 * H]
        g_g = th[:, 2 * H:3 * H]
        o_g = sig[:, 3 * H:4 * H]
        c_new = f_g * c_prev + i_g * g_g
        h_new = o_g * jnp.tanh(c_new)
        return h_new, c_new

    # Static (unrolled) time loop — the recurrence is strictly sequential.
    for t in range(S):
        # ---- layer 1: only the recurrent matmul remains inside the loop.
        gates1 = xg1[t * B:(t + 1) * B, :] + jnp.dot(
            h1, whh1, preferred_element_type=jnp.float32)
        h1, c1 = lstm_cell(gates1, c1)

        # ---- layer 2: single packed matmul on concat([x2, h2]).
        xin2 = jnp.concatenate([h1, h2], axis=1)            # (B, 2H)
        gates2 = jnp.dot(xin2, w2,
                         preferred_element_type=jnp.float32) + b2
        h2, c2 = lstm_cell(gates2, c2)

    # Final FC on the last layer-2 hidden state (== out[:, -1, :]).
    y_ref[...] = (jnp.dot(h2, fcw_ref[...],
                          preferred_element_type=jnp.float32)
                  + fcb_ref[...]).astype(y_ref.dtype)

    # Final hidden/cell states, written exactly once.
    hN_ref[0] = h1.astype(hN_ref.dtype)
    hN_ref[1] = h2.astype(hN_ref.dtype)
    cN_ref[0] = c1.astype(cN_ref.dtype)
    cN_ref[1] = c2.astype(cN_ref.dtype)


# ---------------------------------------------------------------------------
# Model wrapper: prepares layouts and calls the single fused kernel.
# ---------------------------------------------------------------------------
def model_forward(params, x_bsf, hidden):
    """x_bsf: (B, S, input_size).  hidden: (h0, c0), each (n_layers, B, H)."""
    h0_all, c0_all = hidden
    B, S, F = x_bsf.shape
    H = h0_all.shape[-1]
    assert len(params["layers"]) == 2, "fused kernel is specialized to n_layers=2"
    p1, p2 = params["layers"]
    O = params["fc_w_t"].shape[-1]

    # Time-major flat input: rows t*B .. t*B+B-1 hold timestep t.
    x_flat = jnp.transpose(x_bsf, (1, 0, 2)).reshape(S * B, F)
    # Pack layer-2 weights: concat([x, h]) @ W == x @ W_ih^T + h @ W_hh^T.
    w2_packed = jnp.concatenate([p2["w_ih_t"], p2["w_hh_t"]], axis=0)  # (2H, 4H)

    kernel = functools.partial(_fused_lstm_fc_kernel,
                               seq_len=S, batch=B, hidden_size=H)

    out_shapes = (
        jax.ShapeDtypeStruct((B, O), jnp.float32),      # y
        jax.ShapeDtypeStruct((2, B, H), jnp.float32),   # hN
        jax.ShapeDtypeStruct((2, B, H), jnp.float32),   # cN
    )

    y, hN, cN = pl.pallas_call(
        kernel,
        out_shape=out_shapes,
        in_specs=[
            pl.BlockSpec((S * B, F), lambda: (0, 0)),        # x (flat, time-major)
            pl.BlockSpec((2, B, H), lambda: (0, 0, 0)),      # h0
            pl.BlockSpec((2, B, H), lambda: (0, 0, 0)),      # c0
            pl.BlockSpec((F, 4 * H), lambda: (0, 0)),        # W_ih1^T
            pl.BlockSpec((H, 4 * H), lambda: (0, 0)),        # W_hh1^T
            pl.BlockSpec((1, 4 * H), lambda: (0, 0)),        # b1 (= b_ih + b_hh)
            pl.BlockSpec((2 * H, 4 * H), lambda: (0, 0)),    # packed layer-2 W
            pl.BlockSpec((1, 4 * H), lambda: (0, 0)),        # b2
            pl.BlockSpec((H, O), lambda: (0, 0)),            # fc W^T
            pl.BlockSpec((1, O), lambda: (0, 0)),            # fc b
        ],
        out_specs=[
            pl.BlockSpec((B, O), lambda: (0, 0)),
            pl.BlockSpec((2, B, H), lambda: (0, 0, 0)),
            pl.BlockSpec((2, B, H), lambda: (0, 0, 0)),
        ],
    )(x_flat, h0_all, c0_all,
      p1["w_ih_t"], p1["w_hh_t"], p1["b"],
      w2_packed, p2["b"],
      params["fc_w_t"], params["fc_b"])

    return y, (hN, cN)


# ---------------------------------------------------------------------------
# Pure-JAX reference (lax.scan) for correctness checking.
# ---------------------------------------------------------------------------
def reference_forward(params, x_bsf, hidden):
    h0_all, c0_all = hidden
    x = jnp.transpose(x_bsf, (1, 0, 2))
    H = h0_all.shape[-1]

    def make_step(p):
        def step(carry, xt):
            h, c = carry
            gates = xt @ p["w_ih_t"] + h @ p["w_hh_t"] + p["b"][0]
            i = jax.nn.sigmoid(gates[:, 0 * H:1 * H])
            f = jax.nn.sigmoid(gates[:, 1 * H:2 * H])
            g = jnp.tanh(gates[:, 2 * H:3 * H])
            o = jax.nn.sigmoid(gates[:, 3 * H:4 * H])
            c = f * c + i * g
            h = o * jnp.tanh(c)
            return (h, c), h
        return step

    layer_in = x
    h_finals, c_finals = [], []
    for l, p in enumerate(params["layers"]):
        (hN, cN), out_seq = jax.lax.scan(make_step(p), (h0_all[l], c0_all[l]),
                                         layer_in)
        h_finals.append(hN)
        c_finals.append(cN)
        layer_in = out_seq
    y = layer_in[-1] @ params["fc_w_t"] + params["fc_b"][0]
    return y, (jnp.stack(h_finals), jnp.stack(c_finals))


# ---------------------------------------------------------------------------
def init_params(key, input_size, hidden_size, output_size, n_layers):
    """PyTorch-style uniform(-1/sqrt(H), 1/sqrt(H)) init, deterministic."""
    k = 1.0 / np.sqrt(hidden_size)
    layers = []
    for l in range(n_layers):
        in_f = input_size if l == 0 else hidden_size
        key, k1, k2, k3, k4 = jax.random.split(key, 5)
        w_ih = jax.random.uniform(k1, (4 * hidden_size, in_f), jnp.float32, -k, k)
        w_hh = jax.random.uniform(k2, (4 * hidden_size, hidden_size), jnp.float32, -k, k)
        b_ih = jax.random.uniform(k3, (4 * hidden_size,), jnp.float32, -k, k)
        b_hh = jax.random.uniform(k4, (4 * hidden_size,), jnp.float32, -k, k)
        layers.append({
            "w_ih_t": w_ih.T,                       # (in_f, 4H)
            "w_hh_t": w_hh.T,                       # (H, 4H)
            "b": (b_ih + b_hh)[None, :],            # (1, 4H)
        })
    key, k5, k6 = jax.random.split(key, 3)
    fc_w = jax.random.uniform(k5, (output_size, hidden_size), jnp.float32, -k, k)
    fc_b = jax.random.uniform(k6, (output_size,), jnp.float32, -k, k)
    return {"layers": layers, "fc_w_t": fc_w.T, "fc_b": fc_b[None, :]}


if __name__ == "__main__":
    input_size = 1
    hidden_size = 32
    output_size = 1
    n_layers = 2
    batch = 4
    seq = 8

    key = jax.random.PRNGKey(0)
    key, kp, kx, kh, kc = jax.random.split(key, 5)

    params = init_params(kp, input_size, hidden_size, output_size, n_layers)
    x = jax.random.normal(kx, (batch, seq, input_size), jnp.float32)
    # init_hidden in the reference draws normal(mean=-1, std=1)
    h0 = jax.random.normal(kh, (n_layers, batch, hidden_size), jnp.float32) - 1.0
    c0 = jax.random.normal(kc, (n_layers, batch, hidden_size), jnp.float32) - 1.0

    (y, (hN, cN)) = model_forward(params, x, (h0, c0))
    jax.block_until_ready((y, hN, cN))

    y_ref, (hN_ref, cN_ref) = reference_forward(params, x, (h0, c0))
    np.testing.assert_allclose(np.asarray(y), np.asarray(y_ref), rtol=1e-5, atol=1e-5)
    np.testing.assert_allclose(np.asarray(hN), np.asarray(hN_ref), rtol=1e-5, atol=1e-5)
    np.testing.assert_allclose(np.asarray(cN), np.asarray(cN_ref), rtol=1e-5, atol=1e-5)

    print("KERNEL_OK")
</pallas_src>

<mosaic_0001>
module attributes {stable_mosaic.version = 11 : i64} {
  func.func @_fused_lstm_fc_kernel(%arg0: memref<32x1xf32, #tpu.memory_space<vmem>>, %arg1: memref<2x4x32xf32, #tpu.memory_space<vmem>>, %arg2: memref<2x4x32xf32, #tpu.memory_space<vmem>>, %arg3: memref<1x128xf32, #tpu.memory_space<vmem>>, %arg4: memref<32x128xf32, #tpu.memory_space<vmem>>, %arg5: memref<1x128xf32, #tpu.memory_space<vmem>>, %arg6: memref<64x128xf32, #tpu.memory_space<vmem>>, %arg7: memref<1x128xf32, #tpu.memory_space<vmem>>, %arg8: memref<32x1xf32, #tpu.memory_space<vmem>>, %arg9: memref<1x1xf32, #tpu.memory_space<vmem>>, %arg10: memref<4x1xf32, #tpu.memory_space<vmem>>, %arg11: memref<2x4x32xf32, #tpu.memory_space<vmem>>, %arg12: memref<2x4x32xf32, #tpu.memory_space<vmem>>) attributes {dimension_semantics = [], scalar_prefetch = 0 : i64, scratch_operands = 0 : i64, tpu.core_type = #tpu.core_type<tc>} {
    %c0 = arith.constant 0 : index
    %c0_0 = arith.constant 0 : index
    %c0_1 = arith.constant 0 : index
    %0 = vector.load %arg1[%c0, %c0_0, %c0_1] : memref<2x4x32xf32, #tpu.memory_space<vmem>>, vector<1x4x32xf32>
    %1 = vector.shape_cast %0 : vector<1x4x32xf32> to vector<4x32xf32>
    %c0_2 = arith.constant 0 : index
    %c0_3 = arith.constant 0 : index
    %c0_4 = arith.constant 0 : index
    %2 = vector.load %arg2[%c0_2, %c0_3, %c0_4] : memref<2x4x32xf32, #tpu.memory_space<vmem>>, vector<1x4x32xf32>
    %3 = vector.shape_cast %2 : vector<1x4x32xf32> to vector<4x32xf32>
    %c1 = arith.constant 1 : index
    %c0_5 = arith.constant 0 : index
    %c0_6 = arith.constant 0 : index
    %4 = vector.load %arg1[%c1, %c0_5, %c0_6] : memref<2x4x32xf32, #tpu.memory_space<vmem>>, vector<1x4x32xf32>
    %5 = vector.shape_cast %4 : vector<1x4x32xf32> to vector<4x32xf32>
    %c1_7 = arith.constant 1 : index
    %c0_8 = arith.constant 0 : index
    %c0_9 = arith.constant 0 : index
    %6 = vector.load %arg2[%c1_7, %c0_8, %c0_9] : memref<2x4x32xf32, #tpu.memory_space<vmem>>, vector<1x4x32xf32>
    %7 = vector.shape_cast %6 : vector<1x4x32xf32> to vector<4x32xf32>
    %c0_10 = arith.constant 0 : index
    %c0_11 = arith.constant 0 : index
    %8 = vector.load %arg0[%c0_10, %c0_11] : memref<32x1xf32, #tpu.memory_space<vmem>>, vector<32x1xf32>
    %c0_12 = arith.constant 0 : index
    %c0_13 = arith.constant 0 : index
    %9 = vector.load %arg3[%c0_12, %c0_13] : memref<1x128xf32, #tpu.memory_space<vmem>>, vector<1x128xf32>
    %cst = arith.constant dense<0.000000e+00> : vector<32x128xf32>
    %10 = tpu.matmul %8, %9, %cst {dimension_numbers = #tpu.dot_dimension_numbers<[1], [0], [0], [1], [0, 0, 1, 1], [], []>} : vector<32x1xf32>, vector<1x128xf32>, vector<32x128xf32> -> vector<32x128xf32>
    %c0_14 = arith.constant 0 : index
    %c0_15 = arith.constant 0 : index
    %11 = vector.load %arg5[%c0_14, %c0_15] : memref<1x128xf32, #tpu.memory_space<vmem>>, vector<1x128xf32>
    %12 = vector.broadcast %11 : vector<1x128xf32> to vector<32x128xf32>
    %13 = arith.addf %10, %12 : vector<32x128xf32>
    %c0_16 = arith.constant 0 : index
    %c0_17 = arith.constant 0 : index
    %14 = vector.load %arg4[%c0_16, %c0_17] : memref<32x128xf32, #tpu.memory_space<vmem>>, vector<32x128xf32>
    %c0_18 = arith.constant 0 : index
    %c0_19 = arith.constant 0 : index
    %15 = vector.load %arg6[%c0_18, %c0_19] : memref<64x128xf32, #tpu.memory_space<vmem>>, vector<64x128xf32>
    %c0_20 = arith.constant 0 : index
    %c0_21 = arith.constant 0 : index
    %16 = vector.load %arg7[%c0_20, %c0_21] : memref<1x128xf32, #tpu.memory_space<vmem>>, vector<1x128xf32>
    %17 = vector.extract_strided_slice %13 {offsets = [0, 0], sizes = [4, 128], strides = [1, 1]} : vector<32x128xf32> to vector<4x128xf32>
    %cst_22 = arith.constant dense<0.000000e+00> : vector<4x128xf32>
    %18 = tpu.matmul %1, %14, %cst_22 {dimension_numbers = #tpu.dot_dimension_numbers<[1], [0], [0], [1], [0, 0, 1, 1], [], []>} : vector<4x32xf32>, vector<32x128xf32>, vector<4x128xf32> -> vector<4x128xf32>
    %19 = arith.addf %17, %18 : vector<4x128xf32>
    %20 = arith.negf %19 : vector<4x128xf32>
    %21 = math.exp %20 : vector<4x128xf32>
    %cst_23 = arith.constant 1.000000e+00 : f32
    %22 = vector.broadcast %cst_23 : f32 to vector<4x128xf32>
    %23 = arith.addf %22, %21 : vector<4x128xf32>
    %24 = arith.divf %22, %23 : vector<4x128xf32>
    %25 = math.tanh %19 : vector<4x128xf32>
    %26 = vector.extract_strided_slice %24 {offsets = [0, 0], sizes = [4, 32], strides = [1, 1]} : vector<4x128xf32> to vector<4x32xf32>
    %27 = vector.extract_strided_slice %24 {offsets = [0, 32], sizes = [4, 32], strides = [1, 1]} : vector<4x128xf32> to vector<4x32xf32>
    %28 = vector.extract_strided_slice %25 {offsets = [0, 64], sizes = [4, 32], strides = [1, 1]} : vector<4x128xf32> to vector<4x32xf32>
    %29 = vector.extract_strided_slice %24 {offsets = [0, 96], sizes = [4, 32], strides = [1, 1]} : vector<4x128xf32> to vector<4x32xf32>
    %30 = arith.mulf %27, %3 : vector<4x32xf32>
    %31 = arith.mulf %26, %28 : vector<4x32xf32>
    %32 = arith.addf %30, %31 : vector<4x32xf32>
    %33 = math.tanh %32 : vector<4x32xf32>
    %34 = arith.mulf %29, %33 : vector<4x32xf32>
    %35 = tpu.concatenate %34, %5 in 1 : vector<4x32xf32>, vector<4x32xf32> -> vector<4x64xf32>
    %cst_24 = arith.constant dense<0.000000e+00> : vector<4x128xf32>
    %36 = tpu.matmul %35, %15, %cst_24 {dimension_numbers = #tpu.dot_dimension_numbers<[1], [0], [0], [1], [0, 0, 1, 1], [], []>} : vector<4x64xf32>, vector<64x128xf32>, vector<4x128xf32> -> vector<4x128xf32>
    %37 = vector.broadcast %16 : vector<1x128xf32> to vector<4x128xf32>
    %38 = arith.addf %36, %37 : vector<4x128xf32>
    %39 = arith.negf %38 : vector<4x128xf32>
    %40 = math.exp %39 : vector<4x128xf32>
    %cst_25 = arith.constant 1.000000e+00 : f32
    %41 = vector.broadcast %cst_25 : f32 to vector<4x128xf32>
    %42 = arith.addf %41, %40 : vector<4x128xf32>
    %43 = arith.divf %41, %42 : vector<4x128xf32>
    %44 = math.tanh %38 : vector<4x128xf32>
    %45 = vector.extract_strided_slice %43 {offsets = [0, 0], sizes = [4, 32], strides = [1, 1]} : vector<4x128xf32> to vector<4x32xf32>
    %46 = vector.extract_strided_slice %43 {offsets = [0, 32], sizes = [4, 32], strides = [1, 1]} : vector<4x128xf32> to vector<4x32xf32>
    %47 = vector.extract_strided_slice %44 {offsets = [0, 64], sizes = [4, 32], strides = [1, 1]} : vector<4x128xf32> to vector<4x32xf32>
    %48 = vector.extract_strided_slice %43 {offsets = [0, 96], sizes = [4, 32], strides = [1, 1]} : vector<4x128xf32> to vector<4x32xf32>
    %49 = arith.mulf %46, %7 : vector<4x32xf32>
    %50 = arith.mulf %45, %47 : vector<4x32xf32>
    %51 = arith.addf %49, %50 : vector<4x32xf32>
    %52 = math.tanh %51 : vector<4x32xf32>
    %53 = arith.mulf %48, %52 : vector<4x32xf32>
    %54 = vector.extract_strided_slice %13 {offsets = [4, 0], sizes = [4, 128], strides = [1, 1]} : vector<32x128xf32> to vector<4x128xf32>
    %cst_26 = arith.constant dense<0.000000e+00> : vector<4x128xf32>
    %55 = tpu.matmul %34, %14, %cst_26 {dimension_numbers = #tpu.dot_dimension_numbers<[1], [0], [0], [1], [0, 0, 1, 1], [], []>} : vector<4x32xf32>, vector<32x128xf32>, vector<4x128xf32> -> vector<4x128xf32>
    %56 = arith.addf %54, %55 : vector<4x128xf32>
    %57 = arith.negf %56 : vector<4x128xf32>
    %58 = math.exp %57 : vector<4x128xf32>
    %cst_27 = arith.constant 1.000000e+00 : f32
    %59 = vector.broadcast %cst_27 : f32 to vector<4x128xf32>
    %60 = arith.addf %59, %58 : vector<4x128xf32>
    %61 = arith.divf %59, %60 : vector<4x128xf32>
    %62 = math.tanh %56 : vector<4x128xf32>
    %63 = vector.extract_strided_slice %61 {offsets = [0, 0], sizes = [4, 32], strides = [1, 1]} : vector<4x128xf32> to vector<4x32xf32>
    %64 = vector.extract_strided_slice %61 {offsets = [0, 32], sizes = [4, 32], strides = [1, 1]} : vector<4x128xf32> to vector<4x32xf32>
    %65 = vector.extract_strided_slice %62 {offsets = [0, 64], sizes = [4, 32], strides = [1, 1]} : vector<4x128xf32> to vector<4x32xf32>
    %66 = vector.extract_strided_slice %61 {offsets = [0, 96], sizes = [4, 32], strides = [1, 1]} : vector<4x128xf32> to vector<4x32xf32>
    %67 = arith.mulf %64, %32 : vector<4x32xf32>
    %68 = arith.mulf %63, %65 : vector<4x32xf32>
    %69 = arith.addf %67, %68 : vector<4x32xf32>
    %70 = math.tanh %69 : vector<4x32xf32>
    %71 = arith.mulf %66, %70 : vector<4x32xf32>
    %72 = tpu.concatenate %71, %53 in 1 : vector<4x32xf32>, vector<4x32xf32> -> vector<4x64xf32>
    %cst_28 = arith.constant dense<0.000000e+00> : vector<4x128xf32>
    %73 = tpu.matmul %72, %15, %cst_28 {dimension_numbers = #tpu.dot_dimension_numbers<[1], [0], [0], [1], [0, 0, 1, 1], [], []>} : vector<4x64xf32>, vector<64x128xf32>, vector<4x128xf32> -> vector<4x128xf32>
    %74 = vector.broadcast %16 : vector<1x128xf32> to vector<4x128xf32>
    %75 = arith.addf %73, %74 : vector<4x128xf32>
    %76 = arith.negf %75 : vector<4x128xf32>
    %77 = math.exp %76 : vector<4x128xf32>
    %cst_29 = arith.constant 1.000000e+00 : f32
    %78 = vector.broadcast %cst_29 : f32 to vector<4x128xf32>
    %79 = arith.addf %78, %77 : vector<4x128xf32>
    %80 = arith.divf %78, %79 : vector<4x128xf32>
    %81 = math.tanh %75 : vector<4x128xf32>
    %82 = vector.extract_strided_slice %80 {offsets = [0, 0], sizes = [4, 32], strides = [1, 1]} : vector<4x128xf32> to vector<4x32xf32>
    %83 = vector.extract_strided_slice %80 {offsets = [0, 32], sizes = [4, 32], strides = [1, 1]} : vector<4x128xf32> to vector<4x32xf32>
    %84 = vector.extract_strided_slice %81 {offsets = [0, 64], sizes = [4, 32], strides = [1, 1]} : vector<4x128xf32> to vector<4x32xf32>
    %85 = vector.extract_strided_slice %80 {offsets = [0, 96], sizes = [4, 32], strides = [1, 1]} : vector<4x128xf32> to vector<4x32xf32>
    %86 = arith.mulf %83, %51 : vector<4x32xf32>
    %87 = arith.mulf %82, %84 : vector<4x32xf32>
    %88 = arith.addf %86, %87 : vector<4x32xf32>
    %89 = math.tanh %88 : vector<4x32xf32>
    %90 = arith.mulf %85, %89 : vector<4x32xf32>
    %91 = vector.extract_strided_slice %13 {offsets = [8, 0], sizes = [4, 128], strides = [1, 1]} : vector<32x128xf32> to vector<4x128xf32>
    %cst_30 = arith.constant dense<0.000000e+00> : vector<4x128xf32>
    %92 = tpu.matmul %71, %14, %cst_30 {dimension_numbers = #tpu.dot_dimension_numbers<[1], [0], [0], [1], [0, 0, 1, 1], [], []>} : vector<4x32xf32>, vector<32x128xf32>, vector<4x128xf32> -> vector<4x128xf32>
    %93 = arith.addf %91, %92 : vector<4x128xf32>
    %94 = arith.negf %93 : vector<4x128xf32>
    %95 = math.exp %94 : vector<4x128xf32>
    %cst_31 = arith.constant 1.000000e+00 : f32
    %96 = vector.broadcast %cst_31 : f32 to vector<4x128xf32>
    %97 = arith.addf %96, %95 : vector<4x128xf32>
    %98 = arith.divf %96, %97 : vector<4x128xf32>
    %99 = math.tanh %93 : vector<4x128xf32>
    %100 = vector.extract_strided_slice %98 {offsets = [0, 0], sizes = [4, 32], strides = [1, 1]} : vector<4x128xf32> to vector<4x32xf32>
    %101 = vector.extract_strided_slice %98 {offsets = [0, 32], sizes = [4, 32], strides = [1, 1]} : vector<4x128xf32> to vector<4x32xf32>
    %102 = vector.extract_strided_slice %99 {offsets = [0, 64], sizes = [4, 32], strides = [1, 1]} : vector<4x128xf32> to vector<4x32xf32>
    %103 = vector.extract_strided_slice %98 {offsets = [0, 96], sizes = [4, 32], strides = [1, 1]} : vector<4x128xf32> to vector<4x32xf32>
    %104 = arith.mulf %101, %69 : vector<4x32xf32>
    %105 = arith.mulf %100, %102 : vector<4x32xf32>
    %106 = arith.addf %104, %105 : vector<4x32xf32>
    %107 = math.tanh %106 : vector<4x32xf32>
    %108 = arith.mulf %103, %107 : vector<4x32xf32>
    %109 = tpu.concatenate %108, %90 in 1 : vector<4x32xf32>, vector<4x32xf32> -> vector<4x64xf32>
    %cst_32 = arith.constant dense<0.000000e+00> : vector<4x128xf32>
    %110 = tpu.matmul %109, %15, %cst_32 {dimension_numbers = #tpu.dot_dimension_numbers<[1], [0], [0], [1], [0, 0, 1, 1], [], []>} : vector<4x64xf32>, vector<64x128xf32>, vector<4x128xf32> -> vector<4x128xf32>
    %111 = vector.broadcast %16 : vector<1x128xf32> to vector<4x128xf32>
    %112 = arith.addf %110, %111 : vector<4x128xf32>
    %113 = arith.negf %112 : vector<4x128xf32>
    %114 = math.exp %113 : vector<4x128xf32>
    %cst_33 = arith.constant 1.000000e+00 : f32
    %115 = vector.broadcast %cst_33 : f32 to vector<4x128xf32>
    %116 = arith.addf %115, %114 : vector<4x128xf32>
    %117 = arith.divf %115, %116 : vector<4x128xf32>
    %118 = math.tanh %112 : vector<4x128xf32>
    %119 = vector.extract_strided_slice %117 {offsets = [0, 0], sizes = [4, 32], strides = [1, 1]} : vector<4x128xf32> to vector<4x32xf32>
    %120 = vector.extract_strided_slice %117 {offsets = [0, 32], sizes = [4, 32], strides = [1, 1]} : vector<4x128xf32> to vector<4x32xf32>
    %121 = vector.extract_strided_slice %118 {offsets = [0, 64], sizes = [4, 32], strides = [1, 1]} : vector<4x128xf32> to vector<4x32xf32>
    %122 = vector.extract_strided_slice %117 {offsets = [0, 96], sizes = [4, 32], strides = [1, 1]} : vector<4x128xf32> to vector<4x32xf32>
    %123 = arith.mulf %120, %88 : vector<4x32xf32>
    %124 = arith.mulf %119, %121 : vector<4x32xf32>
    %125 = arith.addf %123, %124 : vector<4x32xf32>
    %126 = math.tanh %125 : vector<4x32xf32>
    %127 = arith.mulf %122, %126 : vector<4x32xf32>
    %128 = vector.extract_strided_slice %13 {offsets = [12, 0], sizes = [4, 128], strides = [1, 1]} : vector<32x128xf32> to vector<4x128xf32>
    %cst_34 = arith.constant dense<0.000000e+00> : vector<4x128xf32>
    %129 = tpu.matmul %108, %14, %cst_34 {dimension_numbers = #tpu.dot_dimension_numbers<[1], [0], [0], [1], [0, 0, 1, 1], [], []>} : vector<4x32xf32>, vector<32x128xf32>, vector<4x128xf32> -> vector<4x128xf32>
    %130 = arith.addf %128, %129 : vector<4x128xf32>
    %131 = arith.negf %130 : vector<4x128xf32>
    %132 = math.exp %131 : vector<4x128xf32>
    %cst_35 = arith.constant 1.000000e+00 : f32
    %133 = vector.broadcast %cst_35 : f32 to vector<4x128xf32>
    %134 = arith.addf %133, %132 : vector<4x128xf32>
    %135 = arith.divf %133, %134 : vector<4x128xf32>
    %136 = math.tanh %130 : vector<4x128xf32>
    %137 = vector.extract_strided_slice %135 {offsets = [0, 0], sizes = [4, 32], strides = [1, 1]} : vector<4x128xf32> to vector<4x32xf32>
    %138 = vector.extract_strided_slice %135 {offsets = [0, 32], sizes = [4, 32], strides = [1, 1]} : vector<4x128xf32> to vector<4x32xf32>
    %139 = vector.extract_strided_slice %136 {offsets = [0, 64], sizes = [4, 32], strides = [1, 1]} : vector<4x128xf32> to vector<4x32xf32>
    %140 = vector.extract_strided_slice %135 {offsets = [0, 96], sizes = [4, 32], strides = [1, 1]} : vector<4x128xf32> to vector<4x32xf32>
    %141 = arith.mulf %138, %106 : vector<4x32xf32>
    %142 = arith.mulf %137, %139 : vector<4x32xf32>
    %143 = arith.addf %141, %142 : vector<4x32xf32>
    %144 = math.tanh %143 : vector<4x32xf32>
    %145 = arith.mulf %140, %144 : vector<4x32xf32>
    %146 = tpu.concatenate %145, %127 in 1 : vector<4x32xf32>, vector<4x32xf32> -> vector<4x64xf32>
    %cst_36 = arith.constant dense<0.000000e+00> : vector<4x128xf32>
    %147 = tpu.matmul %146, %15, %cst_36 {dimension_numbers = #tpu.dot_dimension_numbers<[1], [0], [0], [1], [0, 0, 1, 1], [], []>} : vector<4x64xf32>, vector<64x128xf32>, vector<4x128xf32> -> vector<4x128xf32>
    %148 = vector.broadcast %16 : vector<1x128xf32> to vector<4x128xf32>
    %149 = arith.addf %147, %148 : vector<4x128xf32>
    %150 = arith.negf %149 : vector<4x128xf32>
    %151 = math.exp %150 : vector<4x128xf32>
    %cst_37 = arith.constant 1.000000e+00 : f32
    %152 = vector.broadcast %cst_37 : f32 to vector<4x128xf32>
    %153 = arith.addf %152, %151 : vector<4x128xf32>
    %154 = arith.divf %152, %153 : vector<4x128xf32>
    %155 = math.tanh %149 : vector<4x128xf32>
    %156 = vector.extract_strided_slice %154 {offsets = [0, 0], sizes = [4, 32], strides = [1, 1]} : vector<4x128xf32> to vector<4x32xf32>
    %157 = vector.extract_strided_slice %154 {offsets = [0, 32], sizes = [4, 32], strides = [1, 1]} : vector<4x128xf32> to vector<4x32xf32>
    %158 = vector.extract_strided_slice %155 {offsets = [0, 64], sizes = [4, 32], strides = [1, 1]} : vector<4x128xf32> to vector<4x32xf32>
    %159 = vector.extract_strided_slice %154 {offsets = [0, 96], sizes = [4, 32], strides = [1, 1]} : vector<4x128xf32> to vector<4x32xf32>
    %160 = arith.mulf %157, %125 : vector<4x32xf32>
    %161 = arith.mulf %156, %158 : vector<4x32xf32>
    %162 = arith.addf %160, %161 : vector<4x32xf32>
    %163 = math.tanh %162 : vector<4x32xf32>
    %164 = arith.mulf %159, %163 : vector<4x32xf32>
    %165 = vector.extract_strided_slice %13 {offsets = [16, 0], sizes = [4, 128], strides = [1, 1]} : vector<32x128xf32> to vector<4x128xf32>
    %cst_38 = arith.constant dense<0.000000e+00> : vector<4x128xf32>
    %166 = tpu.matmul %145, %14, %cst_38 {dimension_numbers = #tpu.dot_dimension_numbers<[1], [0], [0], [1], [0, 0, 1, 1], [], []>} : vector<4x32xf32>, vector<32x128xf32>, vector<4x128xf32> -> vector<4x128xf32>
    %167 = arith.addf %165, %166 : vector<4x128xf32>
    %168 = arith.negf %167 : vector<4x128xf32>
    %169 = math.exp %168 : vector<4x128xf32>
    %cst_39 = arith.constant 1.000000e+00 : f32
    %170 = vector.broadcast %cst_39 : f32 to vector<4x128xf32>
    %171 = arith.addf %170, %169 : vector<4x128xf32>
    %172 = arith.divf %170, %171 : vector<4x128xf32>
    %173 = math.tanh %167 : vector<4x128xf32>
    %174 = vector.extract_strided_slice %172 {offsets = [0, 0], sizes = [4, 32], strides = [1, 1]} : vector<4x128xf32> to vector<4x32xf32>
    %175 = vector.extract_strided_slice %172 {offsets = [0, 32], sizes = [4, 32], strides = [1, 1]} : vector<4x128xf32> to vector<4x32xf32>
    %176 = vector.extract_strided_slice %173 {offsets = [0, 64], sizes = [4, 32], strides = [1, 1]} : vector<4x128xf32> to vector<4x32xf32>
    %177 = vector.extract_strided_slice %172 {offsets = [0, 96], sizes = [4, 32], strides = [1, 1]} : vector<4x128xf32> to vector<4x32xf32>
    %178 = arith.mulf %175, %143 : vector<4x32xf32>
    %179 = arith.mulf %174, %176 : vector<4x32xf32>
    %180 = arith.addf %178, %179 : vector<4x32xf32>
    %181 = math.tanh %180 : vector<4x32xf32>
    %182 = arith.mulf %177, %181 : vector<4x32xf32>
    %183 = tpu.concatenate %182, %164 in 1 : vector<4x32xf32>, vector<4x32xf32> -> vector<4x64xf32>
    %cst_40 = arith.constant dense<0.000000e+00> : vector<4x128xf32>
    %184 = tpu.matmul %183, %15, %cst_40 {dimension_numbers = #tpu.dot_dimension_numbers<[1], [0], [0], [1], [0, 0, 1, 1], [], []>} : vector<4x64xf32>, vector<64x128xf32>, vector<4x128xf32> -> vector<4x128xf32>
    %185 = vector.broadcast %16 : vector<1x128xf32> to vector<4x128xf32>
    %186 = arith.addf %184, %185 : vector<4x128xf32>
    %187 = arith.negf %186 : vector<4x128xf32>
    %188 = math.exp %187 : vector<4x128xf32>
    %cst_41 = arith.constant 1.000000e+00 : f32
    %189 = vector.broadcast %cst_41 : f32 to vector<4x128xf32>
    %190 = arith.addf %189, %188 : vector<4x128xf32>
    %191 = arith.divf %189, %190 : vector<4x128xf32>
    %192 = math.tanh %186 : vector<4x128xf32>
    %193 = vector.extract_strided_slice %191 {offsets = [0, 0], sizes = [4, 32], strides = [1, 1]} : vector<4x128xf32> to vector<4x32xf32>
    %194 = vector.extract_strided_slice %191 {offsets = [0, 32], sizes = [4, 32], strides = [1, 1]} : vector<4x128xf32> to vector<4x32xf32>
    %195 = vector.extract_strided_slice %192 {offsets = [0, 64], sizes = [4, 32], strides = [1, 1]} : vector<4x128xf32> to vector<4x32xf32>
    %196 = vector.extract_strided_slice %191 {offsets = [0, 96], sizes = [4, 32], strides = [1, 1]} : vector<4x128xf32> to vector<4x32xf32>
    %197 = arith.mulf %194, %162 : vector<4x32xf32>
    %198 = arith.mulf %193, %195 : vector<4x32xf32>
    %199 = arith.addf %197, %198 : vector<4x32xf32>
    %200 = math.tanh %199 : vector<4x32xf32>
    %201 = arith.mulf %196, %200 : vector<4x32xf32>
    %202 = vector.extract_strided_slice %13 {offsets = [20, 0], sizes = [4, 128], strides = [1, 1]} : vector<32x128xf32> to vector<4x128xf32>
    %cst_42 = arith.constant dense<0.000000e+00> : vector<4x128xf32>
    %203 = tpu.matmul %182, %14, %cst_42 {dimension_numbers = #tpu.dot_dimension_numbers<[1], [0], [0], [1], [0, 0, 1, 1], [], []>} : vector<4x32xf32>, vector<32x128xf32>, vector<4x128xf32> -> vector<4x128xf32>
    %204 = arith.addf %202, %203 : vector<4x128xf32>
    %205 = arith.negf %204 : vector<4x128xf32>
    %206 = math.exp %205 : vector<4x128xf32>
    %cst_43 = arith.constant 1.000000e+00 : f32
    %207 = vector.broadcast %cst_43 : f32 to vector<4x128xf32>
    %208 = arith.addf %207, %206 : vector<4x128xf32>
    %209 = arith.divf %207, %208 : vector<4x128xf32>
    %210 = math.tanh %204 : vector<4x128xf32>
    %211 = vector.extract_strided_slice %209 {offsets = [0, 0], sizes = [4, 32], strides = [1, 1]} : vector<4x128xf32> to vector<4x32xf32>
    %212 = vector.extract_strided_slice %209 {offsets = [0, 32], sizes = [4, 32], strides = [1, 1]} : vector<4x128xf32> to vector<4x32xf32>
    %213 = vector.extract_strided_slice %210 {offsets = [0, 64], sizes = [4, 32], strides = [1, 1]} : vector<4x128xf32> to vector<4x32xf32>
    %214 = vector.extract_strided_slice %209 {offsets = [0, 96], sizes = [4, 32], strides = [1, 1]} : vector<4x128xf32> to vector<4x32xf32>
    %215 = arith.mulf %212, %180 : vector<4x32xf32>
    %216 = arith.mulf %211, %213 : vector<4x32xf32>
    %217 = arith.addf %215, %216 : vector<4x32xf32>
    %218 = math.tanh %217 : vector<4x32xf32>
    %219 = arith.mulf %214, %218 : vector<4x32xf32>
    %220 = tpu.concatenate %219, %201 in 1 : vector<4x32xf32>, vector<4x32xf32> -> vector<4x64xf32>
    %cst_44 = arith.constant dense<0.000000e+00> : vector<4x128xf32>
    %221 = tpu.matmul %220, %15, %cst_44 {dimension_numbers = #tpu.dot_dimension_numbers<[1], [0], [0], [1], [0, 0, 1, 1], [], []>} : vector<4x64xf32>, vector<64x128xf32>, vector<4x128xf32> -> vector<4x128xf32>
    %222 = vector.broadcast %16 : vector<1x128xf32> to vector<4x128xf32>
    %223 = arith.addf %221, %222 : vector<4x128xf32>
    %224 = arith.negf %223 : vector<4x128xf32>
    %225 = math.exp %224 : vector<4x128xf32>
    %cst_45 = arith.constant 1.000000e+00 : f32
    %226 = vector.broadcast %cst_45 : f32 to vector<4x128xf32>
    %227 = arith.addf %226, %225 : vector<4x128xf32>
    %228 = arith.divf %226, %227 : vector<4x128xf32>
    %229 = math.tanh %223 : vector<4x128xf32>
    %230 = vector.extract_strided_slice %228 {offsets = [0, 0], sizes = [4, 32], strides = [1, 1]} : vector<4x128xf32> to vector<4x32xf32>
    %231 = vector.extract_strided_slice %228 {offsets = [0, 32], sizes = [4, 32], strides = [1, 1]} : vector<4x128xf32> to vector<4x32xf32>
    %232 = vector.extract_strided_slice %229 {offsets = [0, 64], sizes = [4, 32], strides = [1, 1]} : vector<4x128xf32> to vector<4x32xf32>
    %233 = vector.extract_strided_slice %228 {offsets = [0, 96], sizes = [4, 32], strides = [1, 1]} : vector<4x128xf32> to vector<4x32xf32>
    %234 = arith.mulf %231, %199 : vector<4x32xf32>
    %235 = arith.mulf %230, %232 : vector<4x32xf32>
    %236 = arith.addf %234, %235 : vector<4x32xf32>
    %237 = math.tanh %236 : vector<4x32xf32>
    %238 = arith.mulf %233, %237 : vector<4x32xf32>
    %239 = vector.extract_strided_slice %13 {offsets = [24, 0], sizes = [4, 128], strides = [1, 1]} : vector<32x128xf32> to vector<4x128xf32>
    %cst_46 = arith.constant dense<0.000000e+00> : vector<4x128xf32>
    %240 = tpu.matmul %219, %14, %cst_46 {dimension_numbers = #tpu.dot_dimension_numbers<[1], [0], [0], [1], [0, 0, 1, 1], [], []>} : vector<4x32xf32>, vector<32x128xf32>, vector<4x128xf32> -> vector<4x128xf32>
    %241 = arith.addf %239, %240 : vector<4x128xf32>
    %242 = arith.negf %241 : vector<4x128xf32>
    %243 = math.exp %242 : vector<4x128xf32>
    %cst_47 = arith.constant 1.000000e+00 : f32
    %244 = vector.broadcast %cst_47 : f32 to vector<4x128xf32>
    %245 = arith.addf %244, %243 : vector<4x128xf32>
    %246 = arith.divf %244, %245 : vector<4x128xf32>
    %247 = math.tanh %241 : vector<4x128xf32>
    %248 = vector.extract_strided_slice %246 {offsets = [0, 0], sizes = [4, 32], strides = [1, 1]} : vector<4x128xf32> to vector<4x32xf32>
    %249 = vector.extract_strided_slice %246 {offsets = [0, 32], sizes = [4, 32], strides = [1, 1]} : vector<4x128xf32> to vector<4x32xf32>
    %250 = vector.extract_strided_slice %247 {offsets = [0, 64], sizes = [4, 32], strides = [1, 1]} : vector<4x128xf32> to vector<4x32xf32>
    %251 = vector.extract_strided_slice %246 {offsets = [0, 96], sizes = [4, 32], strides = [1, 1]} : vector<4x128xf32> to vector<4x32xf32>
    %252 = arith.mulf %249, %217 : vector<4x32xf32>
    %253 = arith.mulf %248, %250 : vector<4x32xf32>
    %254 = arith.addf %252, %253 : vector<4x32xf32>
    %255 = math.tanh %254 : vector<4x32xf32>
    %256 = arith.mulf %251, %255 : vector<4x32xf32>
    %257 = tpu.concatenate %256, %238 in 1 : vector<4x32xf32>, vector<4x32xf32> -> vector<4x64xf32>
    %cst_48 = arith.constant dense<0.000000e+00> : vector<4x128xf32>
    %258 = tpu.matmul %257, %15, %cst_48 {dimension_numbers = #tpu.dot_dimension_numbers<[1], [0], [0], [1], [0, 0, 1, 1], [], []>} : vector<4x64xf32>, vector<64x128xf32>, vector<4x128xf32> -> vector<4x128xf32>
    %259 = vector.broadcast %16 : vector<1x128xf32> to vector<4x128xf32>
    %260 = arith.addf %258, %259 : vector<4x128xf32>
    %261 = arith.negf %260 : vector<4x128xf32>
    %262 = math.exp %261 : vector<4x128xf32>
    %cst_49 = arith.constant 1.000000e+00 : f32
    %263 = vector.broadcast %cst_49 : f32 to vector<4x128xf32>
    %264 = arith.addf %263, %262 : vector<4x128xf32>
    %265 = arith.divf %263, %264 : vector<4x128xf32>
    %266 = math.tanh %260 : vector<4x128xf32>
    %267 = vector.extract_strided_slice %265 {offsets = [0, 0], sizes = [4, 32], strides = [1, 1]} : vector<4x128xf32> to vector<4x32xf32>
    %268 = vector.extract_strided_slice %265 {offsets = [0, 32], sizes = [4, 32], strides = [1, 1]} : vector<4x128xf32> to vector<4x32xf32>
    %269 = vector.extract_strided_slice %266 {offsets = [0, 64], sizes = [4, 32], strides = [1, 1]} : vector<4x128xf32> to vector<4x32xf32>
    %270 = vector.extract_strided_slice %265 {offsets = [0, 96], sizes = [4, 32], strides = [1, 1]} : vector<4x128xf32> to vector<4x32xf32>
    %271 = arith.mulf %268, %236 : vector<4x32xf32>
    %272 = arith.mulf %267, %269 : vector<4x32xf32>
    %273 = arith.addf %271, %272 : vector<4x32xf32>
    %274 = math.tanh %273 : vector<4x32xf32>
    %275 = arith.mulf %270, %274 : vector<4x32xf32>
    %276 = vector.extract_strided_slice %13 {offsets = [28, 0], sizes = [4, 128], strides = [1, 1]} : vector<32x128xf32> to vector<4x128xf32>
    %cst_50 = arith.constant dense<0.000000e+00> : vector<4x128xf32>
    %277 = tpu.matmul %256, %14, %cst_50 {dimension_numbers = #tpu.dot_dimension_numbers<[1], [0], [0], [1], [0, 0, 1, 1], [], []>} : vector<4x32xf32>, vector<32x128xf32>, vector<4x128xf32> -> vector<4x128xf32>
    %278 = arith.addf %276, %277 : vector<4x128xf32>
    %279 = arith.negf %278 : vector<4x128xf32>
    %280 = math.exp %279 : vector<4x128xf32>
    %cst_51 = arith.constant 1.000000e+00 : f32
    %281 = vector.broadcast %cst_51 : f32 to vector<4x128xf32>
    %282 = arith.addf %281, %280 : vector<4x128xf32>
    %283 = arith.divf %281, %282 : vector<4x128xf32>
    %284 = math.tanh %278 : vector<4x128xf32>
    %285 = vector.extract_strided_slice %283 {offsets = [0, 0], sizes = [4, 32], strides = [1, 1]} : vector<4x128xf32> to vector<4x32xf32>
    %286 = vector.extract_strided_slice %283 {offsets = [0, 32], sizes = [4, 32], strides = [1, 1]} : vector<4x128xf32> to vector<4x32xf32>
    %287 = vector.extract_strided_slice %284 {offsets = [0, 64], sizes = [4, 32], strides = [1, 1]} : vector<4x128xf32> to vector<4x32xf32>
    %288 = vector.extract_strided_slice %283 {offsets = [0, 96], sizes = [4, 32], strides = [1, 1]} : vector<4x128xf32> to vector<4x32xf32>
    %289 = arith.mulf %286, %254 : vector<4x32xf32>
    %290 = arith.mulf %285, %287 : vector<4x32xf32>
    %291 = arith.addf %289, %290 : vector<4x32xf32>
    %292 = math.tanh %291 : vector<4x32xf32>
    %293 = arith.mulf %288, %292 : vector<4x32xf32>
    %294 = tpu.concatenate %293, %275 in 1 : vector<4x32xf32>, vector<4x32xf32> -> vector<4x64xf32>
    %cst_52 = arith.constant dense<0.000000e+00> : vector<4x128xf32>
    %295 = tpu.matmul %294, %15, %cst_52 {dimension_numbers = #tpu.dot_dimension_numbers<[1], [0], [0], [1], [0, 0, 1, 1], [], []>} : vector<4x64xf32>, vector<64x128xf32>, vector<4x128xf32> -> vector<4x128xf32>
    %296 = vector.broadcast %16 : vector<1x128xf32> to vector<4x128xf32>
    %297 = arith.addf %295, %296 : vector<4x128xf32>
    %298 = arith.negf %297 : vector<4x128xf32>
    %299 = math.exp %298 : vector<4x128xf32>
    %cst_53 = arith.constant 1.000000e+00 : f32
    %300 = vector.broadcast %cst_53 : f32 to vector<4x128xf32>
    %301 = arith.addf %300, %299 : vector<4x128xf32>
    %302 = arith.divf %300, %301 : vector<4x128xf32>
    %303 = math.tanh %297 : vector<4x128xf32>
    %304 = vector.extract_strided_slice %302 {offsets = [0, 0], sizes = [4, 32], strides = [1, 1]} : vector<4x128xf32> to vector<4x32xf32>
    %305 = vector.extract_strided_slice %302 {offsets = [0, 32], sizes = [4, 32], strides = [1, 1]} : vector<4x128xf32> to vector<4x32xf32>
    %306 = vector.extract_strided_slice %303 {offsets = [0, 64], sizes = [4, 32], strides = [1, 1]} : vector<4x128xf32> to vector<4x32xf32>
    %307 = vector.extract_strided_slice %302 {offsets = [0, 96], sizes = [4, 32], strides = [1, 1]} : vector<4x128xf32> to vector<4x32xf32>
    %308 = arith.mulf %305, %273 : vector<4x32xf32>
    %309 = arith.mulf %304, %306 : vector<4x32xf32>
    %310 = arith.addf %308, %309 : vector<4x32xf32>
    %311 = math.tanh %310 : vector<4x32xf32>
    %312 = arith.mulf %307, %311 : vector<4x32xf32>
    %c0_54 = arith.constant 0 : index
    %c0_55 = arith.constant 0 : index
    %313 = vector.load %arg8[%c0_54, %c0_55] : memref<32x1xf32, #tpu.memory_space<vmem>>, vector<32x1xf32>
    %cst_56 = arith.constant dense<0.000000e+00> : vector<4x1xf32>
    %314 = tpu.matmul %312, %313, %cst_56 {dimension_numbers = #tpu.dot_dimension_numbers<[1], [0], [0], [1], [0, 0, 1, 1], [], []>} : vector<4x32xf32>, vector<32x1xf32>, vector<4x1xf32> -> vector<4x1xf32>
    %c0_57 = arith.constant 0 : index
    %c0_58 = arith.constant 0 : index
    %315 = vector.load %arg9[%c0_57, %c0_58] : memref<1x1xf32, #tpu.memory_space<vmem>>, vector<1x1xf32>
    %316 = vector.broadcast %315 : vector<1x1xf32> to vector<4x1xf32>
    %317 = arith.addf %314, %316 : vector<4x1xf32>
    %c0_59 = arith.constant 0 : index
    %c0_60 = arith.constant 0 : index
    %318 = vector.load %arg10[%c0_59, %c0_60] : memref<4x1xf32, #tpu.memory_space<vmem>>, vector<4x1xf32>
    tpu.vector_store %arg10[%c0_59, %c0_60], %317 {strides = array<i32>} : memref<4x1xf32, #tpu.memory_space<vmem>>, vector<4x1xf32>,
    %c0_61 = arith.constant 0 : index
    %c0_62 = arith.constant 0 : index
    %c0_63 = arith.constant 0 : index
    %319 = vector.load %arg11[%c0_61, %c0_62, %c0_63] : memref<2x4x32xf32, #tpu.memory_space<vmem>>, vector<1x4x32xf32>
    %320 = vector.shape_cast %319 : vector<1x4x32xf32> to vector<4x32xf32>
    %321 = vector.shape_cast %293 : vector<4x32xf32> to vector<1x4x32xf32>
    tpu.vector_store %arg11[%c0_61, %c0_62, %c0_63], %321 {strides = array<i32>} : memref<2x4x32xf32, #tpu.memory_space<vmem>>, vector<1x4x32xf32>,
    %c1_64 = arith.constant 1 : index
    %c0_65 = arith.constant 0 : index
    %c0_66 = arith.constant 0 : index
    %322 = vector.load %arg11[%c1_64, %c0_65, %c0_66] : memref<2x4x32xf32, #tpu.memory_space<vmem>>, vector<1x4x32xf32>
    %323 = vector.shape_cast %322 : vector<1x4x32xf32> to vector<4x32xf32>
    %324 = vector.shape_cast %312 : vector<4x32xf32> to vector<1x4x32xf32>
    tpu.vector_store %arg11[%c1_64, %c0_65, %c0_66], %324 {strides = array<i32>} : memref<2x4x32xf32, #tpu.memory_space<vmem>>, vector<1x4x32xf32>,
    %c0_67 = arith.constant 0 : index
    %c0_68 = arith.constant 0 : index
    %c0_69 = arith.constant 0 : index
    %325 = vector.load %arg12[%c0_67, %c0_68, %c0_69] : memref<2x4x32xf32, #tpu.memory_space<vmem>>, vector<1x4x32xf32>
    %326 = vector.shape_cast %325 : vector<1x4x32xf32> to vector<4x32xf32>
    %327 = vector.shape_cast %291 : vector<4x32xf32> to vector<1x4x32xf32>
    tpu.vector_store %arg12[%c0_67, %c0_68, %c0_69], %327 {strides = array<i32>} : memref<2x4x32xf32, #tpu.memory_space<vmem>>, vector<1x4x32xf32>,
    %c1_70 = arith.constant 1 : index
    %c0_71 = arith.constant 0 : index
    %c0_72 = arith.constant 0 : index
    %328 = vector.load %arg12[%c1_70, %c0_71, %c0_72] : memref<2x4x32xf32, #tpu.memory_space<vmem>>, vector<1x4x32xf32>
    %329 = vector.shape_cast %328 : vector<1x4x32xf32> to vector<4x32xf32>
    %330 = vector.shape_cast %310 : vector<4x32xf32> to vector<1x4x32xf32>
    tpu.vector_store %arg12[%c1_70, %c0_71, %c0_72], %330 {strides = array<i32>} : memref<2x4x32xf32, #tpu.memory_space<vmem>>, vector<1x4x32xf32>,
    return
  }
}

</mosaic_0001>

<bundles_post_ra>
// kernel: tpu_custom_call.1
= control target key start
LH: loop header
LB: loop body
LE: loop exit
PB: predicated region body
PF: predicated region fallthrough
CT: control target
= control target key end

     0   :  { %s3330_s0 = inlined_call_operand.vmem [shape: f32[32,1], index: 0, kind: input, shape index: {}]   ;;  %s3331_s1 = inlined_call_operand.vmem [shape: f32[2,4,32], index: 1, kind: input, shape index: {}]   ;;  %s3332_s2 = inlined_call_operand.vmem [shape: f32[2,4,32], index: 2, kind: input, shape index: {}]   ;;  %s3333_s3 = inlined_call_operand.vmem [shape: f32[1,128], index: 3, kind: input, shape index: {}]   ;;  %s3334_s4 = inlined_call_operand.hbm [shape: f32[32,128], index: 4, kind: input, shape index: {}]   ;;  %s3335_s5 = inlined_call_operand.vmem [shape: f32[1,128], index: 5, kind: input, shape index: {}]   ;;  %s3336_s6 = inlined_call_operand.vmem [shape: f32[64,128], index: 6, kind: input, shape index: {}]   ;;  %s3337_s7 = inlined_call_operand.vmem [shape: f32[1,128], index: 7, kind: input, shape index: {}]   ;;  %s3338_s8 = inlined_call_operand.vmem [shape: f32[32,1], index: 8, kind: input, shape index: {}]   ;;  %s3339_s9 = inlined_call_operand.<no memory space> [shape: f32[1,1], index: 9, kind: input, shape index: {}]   ;;  %s3340_s10 = inlined_call_operand.vmem [shape: f32[4,1], index: 10, kind: output, shape index: {0}]   ;;  %s3341_s11 = inlined_call_operand.hbm [shape: f32[2,4,32], index: 11, kind: output, shape index: {1}]   ;;  %s3342_s12 = inlined_call_operand.hbm [shape: f32[2,4,32], index: 12, kind: output, shape index: {2}]  }
   0x1   :  { %v18_v0 = vstv %s3339_s9 }
   0x2   :  { %19 = vst [vmem:[#allocation2] sm:$0x1] %v18_v0 }
   0x3   :  { %20 = vsyncpa [#allocation4], 0 }
   0x4   :  { %21 = vsyncpa [#allocation5], 0 }
   0x5   :  { %22 = vsyncpa [#allocation8], 0  ;;  %s2808_s23 = smov [#allocation3]   ;;  %s2736_s27 = scalar_lea.hbm %s3334_s4, 512 }
   0x6   :  { %s36_s24 = sshll.u32 %s2808_s23, 4  ;;  %p2737_p0 = scmp.ne.s32.totalorder %s3334_s4, %s2736_s27  ;;  %s37_s24 = int_to_ptr.vmem [resolvable:$true] %s36_s24 }
   0x7   :  { %p2740_p1 = scmp.lt.u32.totalorder %s2736_s27, %s3334_s4 }
   0x9   :  { %p2742_p2 = pnand %p2740_p1, %p2737_p0 }
   0xb   :  { %2745 = shalt.err (!%p2742_p2)
}
   0xc   :  { %s2746_s9 = scalar_lea.vmem %s37_s24, 512  ;;  %p2751_p4 = scmp.lt.s32.totalorder %s37_s24, %s37_s24 }
   0xd   :  { %p2747_p3 = scmp.ne.s32.totalorder %s37_s24, %s2746_s9  ;;  %p2752_p5 = scmp.lt.s32.totalorder %s2746_s9, %s2746_s9 }
   0xf   :  { %p2753_p6 = por %p2752_p5, %p2751_p4 }
  0x11   :  { %p2754_p7 = pnand %p2753_p6, %p2747_p3 }
  0x13   :  { %2757 = shalt.err (!%p2754_p7)
}
  0x14   :  { %s2809_s14 = smov 128   ;;  %s2810_s15 = smov 8  }
  0x15   :  { %42 = dma.hbm_to_vmem [thread:$0]  %s3334_s4, 512, %s37_s24, [#allocation4], %s2809_s14, %s2809_s14, %s2810_s15  }
  0x16   :  { %2802 = dma.done.wait [#allocation4], 512  }
  0x17   :  { %2803 = vsyncadd [#allocation4], 4294966784  ;;  %v2811_v1 = vmov 0.0|0.0   ;;  %vm2812_vm0 = vmmov 0   ;;  %v2813_v2 = vmov 0.0   ;;  %vm87_vm1 = vcmask 1040384  }
  0x18   :  { %2446 = vmatprep.subr.bf16.mxu1 %v2811_v1  ;;  %2203 = vmatprep.mubr.msk.f32.mxu1 %vm2812_vm0, %v2813_v2  ;;  %vm74_vm2 = vcmask 7168   ;;  %v176_v3 = vld [vmem:[#allocation3] sm:$0xff]  ;;  %v177_v4 = vld [vmem:[#allocation3 + $0x8] sm:$0xff]  ;;  %v66_v5 = vld [vmem:[%s3333_s3] sm:$0x1]  ;;  %vm189_vm3 = vcmask 261120  }
  0x19   :  { %v2906_v6 = vpack.c.bf16 %v177_v4, %v176_v3  ;;  %2187 = vmatprep.subr.msk.mxu0 %vm87_vm1, %v66_v5  ;;  %v62_v7 = vld [vmem:[%s3330_s0] sm:$0xff]  ;;  %v63_v8 = vld [vmem:[%s3330_s0 + $0x8] sm:$0xff]  ;;  %v178_v9 = vld [vmem:[#allocation3 + $0x10] sm:$0xff]  ;;  %s2814_s26 = smov 64   ;;  %s2815_s29 = smov 32   ;;  %vm307_vm4 = vcmask 523264  }
  0x1a   :  { %2188 = vmatpush3.msk.msra.mxu0 %vm87_vm1, %v66_v5  ;;  %2189 = vmatprep.mubr.msk.f32.mxu0 %vm74_vm2, %v62_v7  ;;  %v179_v10 = vld [vmem:[#allocation3 + $0x18] sm:$0xff]  ;;  %v181_v33 = vld [vmem:[%s3336_s6 + $0x8] sm:$0xff]  ;;  %v182_v34 = vld [vmem:[%s3336_s6 + $0x10] sm:$0xff]  ;;  %vm1968_vm5 = vcmask 261124   ;;  %s2816_s19 = smov 96   ;;  %vm1972_vm6 = vcmask 257024  }
  0x1b   :  { %2448 = vmatpush3.bf16.msra.mxu1 %v2906_v6  ;;  %2190 = vmatmul.mubr.msk.f32.vlgmr.msra.gmra.mrb[0].mxu0 %vm74_vm2, %v63_v8  ;;  %v2917_v11 = vpack.c.bf16 %v179_v10, %v178_v9  ;;  %v56_v12 = vld [vmem:[%s3331_s1] sm:$0xf]  ;;  %v183_v36 = vld [vmem:[%s3336_s6 + $0x18] sm:$0xff]  ;;  %v64_v37 = vld [vmem:[%s3330_s0 + $0x10] sm:$0xff]  ;;  %s2818_s20 = smov [#allocation7]  }
  0x1c   :  { %2449 = vmatprep.subr.bf16.mxu1 %v2811_v1  ;;  %2452 = vmatprep.subr.bf16.mxu0 %v2811_v1  ;;  %v2938_v14 = vld [vmem:[%s3335_s5] ss:$0 sm:$0xff]  ;;  %v65_v38 = vld [vmem:[%s3330_s0 + $0x18] sm:$0xff]  ;;  %v2974_v39 = vpack.c.bf16 %v183_v36, %v182_v34  ;;  %v185_v41 = vld [vmem:[%s3336_s6 + $0x28] sm:$0xff]  ;;  %s2004_s21 = sshll.u32 %s2818_s20, 4  ;;  %s2005_s21 = int_to_ptr.vmem [resolvable:$true] %s2004_s21 }
  0x1d   :  { %v57_v21 = vld [vmem:[%s3332_s2] sm:$0xf]  ;;  %2192 = vmatprep.mubr.msk.f32.mxu0 %vm74_vm2, %v64_v37  ;;  %v186_v43 = vld [vmem:[%s3336_s6 + $0x30] sm:$0xff]  ;;  %v187_v44 = vld [vmem:[%s3336_s6 + $0x38] sm:$0xff] }
  0x1e   :  { %v180_v32 = vld [vmem:[%s3336_s6] sm:$0xff]  ;;  %v2999_v46 = vpack.c.bf16 %v187_v44, %v186_v43 }
  0x1f   :  { %2451 = vmatpush3.bf16.msra.mxu1 %v2917_v11  ;;  %v2962_v35 = vpack.c.bf16 %v181_v33, %v180_v32  ;;  %v184_v40 = vld [vmem:[%s3336_s6 + $0x20] sm:$0xff]  ;;  %2193 = vmatmul.mubr.msk.f32.gmra.mrb[2].mxu0 %vm74_vm2, %v65_v38 }
  0x20   :  { %2464 = vmatprep.subr.bf16.mxu1 %v2811_v1  ;;  %2222 = vmatprep.mubr.msk.f32.mxu0 %vm2812_vm0, %v2813_v2  ;;  %v2988_v42 = vpack.c.bf16 %v185_v41, %v184_v40  ;;  %v2022_v47 = vld [vmem:[%s3331_s1 + $0x4] sm:$0xf]  ;;  %v3035_v55 = vld [vmem:[%s3337_s7] ss:$0 sm:$0xff] }
  0x21   :  { %2454 = vmatpush3.bf16.msra.mxu0 %v2962_v35  ;;  %v2023_v3 = vld [vmem:[%s3332_s2 + $0x4] sm:$0xf] }
  0x22   :  { %2204 = vmatmul.mubr.msk.f32.vlgmr.msra.gmra.mrb[0].mxu1 %vm189_vm3, %v56_v12  ;;  %2455 = vmatprep.subr.bf16.mxu0 %v2811_v1 }
  0x23   :  { %2466 = vmatpush3.bf16.msra.mxu1 %v2906_v6  ;;  %2233 = vmatprep.mubr.msk.f32.mxu1 %vm2812_vm0, %v2813_v2 }
  0x24   :  { %2467 = vmatprep.subr.bf16.mxu1 %v2811_v1 }
  0x25   :  { %2457 = vmatpush3.bf16.msra.mxu0 %v2974_v39 }
  0x26   :  { %2458 = vmatprep.subr.bf16.mxu0 %v2811_v1 }
  0x27   :  { %2469 = vmatpush3.bf16.msra.mxu1 %v2917_v11 }
  0x28   :  { %2470 = vmatprep.subr.bf16.mxu1 %v2811_v1 }
  0x29   :  { %2460 = vmatpush3.bf16.msra.mxu0 %v2988_v42 }
  0x2a   :  { %2461 = vmatprep.subr.bf16.mxu0 %v2811_v1 }
  0x2d   :  { %2463 = vmatpush3.bf16.msra.mxu0 %v2999_v46 }
  0x2e   :  { %2482 = vmatprep.subr.bf16.mxu0 %v2811_v1 }
  0xee   :  { %v2933_v13 = vpop.f32.mrb[0].mxu0 }
  0xef   :  { %v157_v15 = vpop.f32.mrb[1].mxu0  ;;  %v3080_v44 = vadd.f32 %v2933_v13, %v2938_v14 }
  0xf0   :  { %v2941_v16 = vadd.f32 %v2938_v14, %v157_v15 }
  0xf2   :  { %v3009_v50 = vpop.f32.mrb[2].mxu0 }
  0xf3   :  { %v3011_v51 = vpop.f32.mrb[3].mxu0 }
  0xf5   :  { %v259_v17 = vpop.f32.mrb[0].mxu1 }
  0xf6   :  { %v263_v18 = vadd.f32 %v259_v17, %v2941_v16  ;;  %v2205_v19 = vpop.f32.mrb[1].mxu1 }
  0xf8   :  { %2608 = vtanh.f32 %v263_v18  ;;  %v2031_v22 = vmul.f32 -1.442695, %v263_v18 }
  0xfa   :  { %2610 = vpow2.f32 %v2031_v22 }
 0x102   :  { %v2609_v20 = vpop.eup %2608 }
 0x103   :  { %277 = vrot.lane.b32.xlu0 %v2609_v20, %s2814_s26 }
 0x104   :  { %v2611_v23 = vpop.eup %2610 }
 0x105   :  { %v267_v24 = vadd.f32 1.0, %v2611_v23 }
 0x107   :  { %272 = vrot.lane.b32.xlu0 %v57_v21, %s2815_s29  ;;  %2612 = vrcp.f32 %v267_v24 }
 0x111   :  { %v2613_v25 = vpop.eup %2612 }
 0x175   :  { %v278_v26 = vpop.permute.xlu0 %277 }
 0x176   :  { %v280_v27 = vmul.f32 %v2613_v25, %v278_v26 }
 0x178   :  { %282 = vrot.lane.b32.xlu1 %v280_v27, %s2815_s29 }
 0x179   :  { %v273_v28 = vpop.permute.xlu0 %272 }
 0x17a   :  { %v275_v29 = vmul.f32 %v2613_v25, %v273_v28 }
 0x1ea   :  { %v283_v30 = vpop.permute.xlu1 %282 }
 0x1eb   :  { %v2950_v31 = vadd.f32 %v283_v30, %v275_v29 }
 0x1ed   :  { %2614 = vtanh.f32 %v2950_v31  ;;  %v493_v21 = vrot.slane %v2950_v31, 4 }
 0x1f7   :  { %v2615_v45 = vpop.eup %2614 }
 0x1f8   :  { %288 = vrot.lane.b32.xlu1 %v2615_v45, %s2814_s26 }
 0x1fc   :  { %297 = vrot.lane.b32.xlu1 %v2022_v47, %s2815_s29 }
 0x26a   :  { %v289_v48 = vpop.permute.xlu1 %288 }
 0x26b   :  { %v291_v49 = vmul.f32 %v2613_v25, %v289_v48 }
 0x26d   :  { %293 = vrot.lane.b32.xlu0 %v291_v49, %s2815_s29 }
 0x26e   :  { %v298_v52 = vpop.permute.xlu1 %297 }
 0x2df   :  { %v294_v53 = vpop.permute.xlu0 %293 }
 0x2e0   :  { %v300_v54 = vsel %vm189_vm3, %v294_v53, %v298_v52  ;;  %2234 = vmatmul.mubr.msk.f32.vlgmr.msra.gmra.mrb[2].mxu1 %vm189_vm3, %v294_v53 }
 0x2e1   :  { %2223 = vmatmul.mubr.msk.f32.vlgmr.msra.gmra.mrb[4].mxu0 %vm307_vm4, %v300_v54  ;;  %2472 = vmatpush3.bf16.msra.mxu1 %v2962_v35 }
 0x2e2   :  { %2473 = vmatprep.subr.bf16.mxu1 %v2811_v1  ;;  %2484 = vmatpush3.bf16.msra.mxu0 %v2906_v6 }
 0x2e3   :  { %2485 = vmatprep.subr.bf16.mxu0 %v2811_v1  ;;  %2252 = vmatprep.mubr.msk.f32.mxu1 %vm2812_vm0, %v2813_v2 }
 0x2e4   :  { %2263 = vmatprep.mubr.msk.f32.mxu0 %vm2812_vm0, %v2813_v2 }
 0x2e5   :  { %2475 = vmatpush3.bf16.msra.mxu1 %v2974_v39 }
 0x2e6   :  { %2476 = vmatprep.subr.bf16.mxu1 %v2811_v1  ;;  %2487 = vmatpush3.bf16.msra.mxu0 %v2917_v11 }
 0x2e7   :  { %2488 = vmatprep.subr.bf16.mxu0 %v2811_v1 }
 0x2e9   :  { %2478 = vmatpush3.bf16.msra.mxu1 %v2988_v42 }
 0x2ea   :  { %2479 = vmatprep.subr.bf16.mxu1 %v2811_v1 }
 0x2ed   :  { %2481 = vmatpush3.bf16.msra.mxu1 %v2999_v46 }
 0x2ee   :  { %2500 = vmatprep.subr.bf16.mxu1 %v2811_v1 }
 0x3b3   :  { %v477_v56 = vpop.f32.mrb[2].mxu1 }
 0x3b4   :  { %v482_v57 = vrot.slane %v477_v56, 4  ;;  %v377_v58 = vpop.f32.mrb[4].mxu0  ;;  %v2235_v59 = vpop.f32.mrb[3].mxu1 }
 0x3b5   :  { %v378_v60 = vadd.f32 %v3035_v55, %v377_v58  ;;  %v2224_v61 = vpop.f32.mrb[5].mxu0 }
 0x3b6   :  { %v484_v62 = vadd.f32 %v482_v57, %v2941_v16 }
 0x3b7   :  { %2616 = vtanh.f32 %v378_v60  ;;  %v2034_v4 = vmul.f32 -1.442695, %v378_v60 }
 0x3b8   :  { %2618 = vtanh.f32 %v484_v62  ;;  %v2036_v5 = vmul.f32 -1.442695, %v484_v62 }
 0x3b9   :  { %2620 = vpow2.f32 %v2034_v4 }
 0x3ba   :  { %2622 = vpow2.f32 %v2036_v5 }
 0x3c1   :  { %v2617_v63 = vpop.eup %2616 }
 0x3c2   :  { %v2619_v0 = vpop.eup %2618  ;;  %394 = vrot.lane.b32.xlu0 %v2617_v63, %s2814_s26 }
 0x3c3   :  { %497 = vrot.lane.b32.xlu1 %v2619_v0, %s2814_s26  ;;  %v2621_v7 = vpop.eup %2620 }
 0x3c4   :  { %v2623_v8 = vpop.eup %2622  ;;  %v384_v9 = vadd.f32 1.0, %v2621_v7 }
 0x3c5   :  { %v488_v10 = vadd.f32 1.0, %v2623_v8 }
 0x3c6   :  { %389 = vrot.lane.b32.xlu0 %v2023_v3, %s2815_s29  ;;  %2624 = vrcp.f32 %v384_v9 }
 0x3c7   :  { %2626 = vrcp.f32 %v488_v10 }
 0x3d0   :  { %v2625_v12 = vpop.eup %2624 }
 0x3d1   :  { %v2627_v16 = vpop.eup %2626 }
 0x3d2   :  { %v495_v24 = vmul.f32 %v2627_v16, %v493_v21 }
 0x434   :  { %v395_v15 = vpop.permute.xlu0 %394 }
 0x435   :  { %v397_v17 = vmul.f32 %v2625_v12, %v395_v15  ;;  %v498_v18 = vpop.permute.xlu1 %497 }
 0x436   :  { %v500_v19 = vmul.f32 %v2627_v16, %v498_v18 }
 0x437   :  { %399 = vrot.lane.b32.xlu1 %v397_v17, %s2815_s29 }
 0x438   :  { %502 = vrot.lane.b32.xlu0 %v500_v19, %s2815_s29  ;;  %v390_v20 = vpop.permute.xlu0 %389 }
 0x439   :  { %v392_v22 = vmul.f32 %v2625_v12, %v390_v20 }
 0x4a9   :  { %v400_v23 = vpop.permute.xlu1 %399 }
 0x4aa   :  { %v3048_v25 = vadd.f32 %v400_v23, %v392_v22  ;;  %v503_v26 = vpop.permute.xlu0 %502 }
 0x4ab   :  { %v3050_v27 = vadd.f32 %v503_v26, %v495_v24 }
 0x4ac   :  { %2628 = vtanh.f32 %v3048_v25 }
 0x4ad   :  { %2630 = vtanh.f32 %v3050_v27  ;;  %v704_v7 = vrot.slane %v3050_v27, 4 }
 0x4b6   :  { %v2629_v28 = vpop.eup %2628 }
 0x4b7   :  { %v2631_v29 = vpop.eup %2630  ;;  %405 = vrot.lane.b32.xlu1 %v2629_v28, %s2814_s26 }
 0x4b8   :  { %508 = vrot.lane.b32.xlu0 %v2631_v29, %s2814_s26 }
 0x529   :  { %v406_v30 = vpop.permute.xlu1 %405 }
 0x52a   :  { %v408_v31 = vmul.f32 %v2625_v12, %v406_v30  ;;  %v509_v32 = vpop.permute.xlu0 %508 }
 0x52b   :  { %v511_v33 = vmul.f32 %v2627_v16, %v509_v32 }
 0x52c   :  { %v517_v34 = vrot.slane %v408_v31, 4 }
 0x52d   :  { %513 = vrot.lane.b32.xlu1 %v511_v33, %s2815_s29  ;;  %v620_v36 = vrot.slane %v511_v33, 4 }
 0x52e   :  { %518 = vrot.lane.b32.xlu0 %v517_v34, %s2814_s26 }
 0x531   :  { %621 = vrot.lane.b32.xlu1 %v620_v36, %s2815_s29 }
 0x59f   :  { %v514_v37 = vpop.permute.xlu1 %513 }
 0x5a0   :  { %v519_v38 = vpop.permute.xlu0 %518 }
 0x5a1   :  { %v521_v40 = vsel %vm189_vm3, %v514_v37, %v519_v38 }
 0x5a2   :  { %v523_v41 = vrot.slane %v521_v40, 4 }
 0x5a3   :  { %v622_v43 = vpop.permute.xlu1 %621 }
 0x5a4   :  { %2253 = vmatmul.mubr.msk.f32.vlgmr.msra.gmra.mrb[4].mxu1 %vm307_vm4, %v523_v41  ;;  %2264 = vmatmul.mubr.msk.f32.vlgmr.msra.gmra.mrb[6].mxu0 %vm189_vm3, %v622_v43 }
 0x5a5   :  { %2490 = vmatpush3.bf16.msra.mxu0 %v2962_v35  ;;  %2502 = vmatpush3.bf16.msra.mxu1 %v2906_v6 }
 0x5a6   :  { %2491 = vmatprep.subr.bf16.mxu0 %v2811_v1  ;;  %2503 = vmatprep.subr.bf16.mxu1 %v2811_v1 }
 0x5a7   :  { %2293 = vmatprep.mubr.msk.f32.mxu1 %vm2812_vm0, %v2813_v2  ;;  %2282 = vmatprep.mubr.msk.f32.mxu0 %vm2812_vm0, %v2813_v2 }
 0x5a9   :  { %2493 = vmatpush3.bf16.msra.mxu0 %v2974_v39  ;;  %2505 = vmatpush3.bf16.msra.mxu1 %v2917_v11 }
 0x5aa   :  { %2494 = vmatprep.subr.bf16.mxu0 %v2811_v1  ;;  %2506 = vmatprep.subr.bf16.mxu1 %v2811_v1 }
 0x5ad   :  { %2496 = vmatpush3.bf16.msra.mxu0 %v2988_v42 }
 0x5ae   :  { %2497 = vmatprep.subr.bf16.mxu0 %v2811_v1 }
 0x5b1   :  { %2499 = vmatpush3.bf16.msra.mxu0 %v2999_v46 }
 0x5b2   :  { %2518 = vmatprep.subr.bf16.mxu0 %v2811_v1 }
 0x677   :  { %v592_v45 = vpop.f32.mrb[4].mxu1  ;;  %v691_v47 = vpop.f32.mrb[6].mxu0 }
 0x678   :  { %v593_v48 = vadd.f32 %v3035_v55, %v592_v45  ;;  %v695_v49 = vadd.f32 %v691_v47, %v3080_v44  ;;  %v2254_v52 = vpop.f32.mrb[5].mxu1  ;;  %v2265_v53 = vpop.f32.mrb[7].mxu0 }
 0x67a   :  { %2632 = vtanh.f32 %v593_v48  ;;  %v2038_v57 = vmul.f32 -1.442695, %v593_v48  ;;  %v2040_v58 = vmul.f32 -1.442695, %v695_v49 }
 0x67b   :  { %2634 = vtanh.f32 %v695_v49 }
 0x67c   :  { %2636 = vpow2.f32 %v2038_v57 }
 0x67d   :  { %2638 = vpow2.f32 %v2040_v58 }
 0x684   :  { %v2633_v54 = vpop.eup %2632 }
 0x685   :  { %v2635_v56 = vpop.eup %2634  ;;  %605 = vrot.lane.b32.xlu0 %v2633_v54, %s2814_s26 }
 0x686   :  { %708 = vrot.lane.b32.xlu1 %v2635_v56, %s2814_s26  ;;  %v2637_v13 = vpop.eup %2636 }
 0x687   :  { %v2639_v59 = vpop.eup %2638  ;;  %v599_v60 = vadd.f32 1.0, %v2637_v13 }
 0x688   :  { %v699_v61 = vadd.f32 1.0, %v2639_v59 }
 0x689   :  { %2640 = vrcp.f32 %v599_v60 }
 0x68a   :  { %2642 = vrcp.f32 %v699_v61 }
 0x693   :  { %v2641_v62 = vpop.eup %2640 }
 0x694   :  { %v2643_v0 = vpop.eup %2642  ;;  %v603_v8 = vmul.f32 %v2641_v62, %v3048_v25 }
 0x695   :  { %v706_v9 = vmul.f32 %v2643_v0, %v704_v7 }
 0x6f7   :  { %v606_v63 = vpop.permute.xlu0 %605 }
 0x6f8   :  { %v709_v3 = vpop.permute.xlu1 %708  ;;  %v608_v4 = vmul.f32 %v2641_v62, %v606_v63 }
 0x6f9   :  { %v711_v5 = vmul.f32 %v2643_v0, %v709_v3 }
 0x6fa   :  { %610 = vrot.lane.b32.xlu0 %v608_v4, %s2815_s29 }
 0x6fb   :  { %713 = vrot.lane.b32.xlu1 %v711_v5, %s2815_s29 }
 0x76c   :  { %v611_v10 = vpop.permute.xlu0 %610 }
 0x76d   :  { %v714_v12 = vpop.permute.xlu1 %713  ;;  %v3090_v15 = vadd.f32 %v611_v10, %v603_v8 }
 0x76e   :  { %v3092_v16 = vadd.f32 %v714_v12, %v706_v9 }
 0x76f   :  { %2644 = vtanh.f32 %v3090_v15 }
 0x770   :  { %2646 = vtanh.f32 %v3092_v16  ;;  %v913_v53 = vrot.slane %v3092_v16, 4 }
 0x779   :  { %v2645_v17 = vpop.eup %2644 }
 0x77a   :  { %v2647_v18 = vpop.eup %2646  ;;  %616 = vrot.lane.b32.xlu0 %v2645_v17, %s2814_s26 }
 0x77b   :  { %719 = vrot.lane.b32.xlu1 %v2647_v18, %s2814_s26 }
 0x7ec   :  { %v617_v19 = vpop.permute.xlu0 %616 }
 0x7ed   :  { %v720_v20 = vpop.permute.xlu1 %719  ;;  %v619_v21 = vmul.f32 %v2641_v62, %v617_v19 }
 0x7ee   :  { %v722_v22 = vmul.f32 %v2643_v0, %v720_v20 }
 0x7ef   :  { %728 = vrot.lane.b32.xlu1 %v619_v21, %s2814_s26 }
 0x7f0   :  { %724 = vrot.lane.b32.xlu0 %v722_v22, %s2815_s29 }
 0x861   :  { %v729_v23 = vpop.permute.xlu1 %728 }
 0x862   :  { %v725_v24 = vpop.permute.xlu0 %724 }
 0x863   :  { %v731_v25 = vsel %vm189_vm3, %v725_v24, %v729_v23  ;;  %2294 = vmatmul.mubr.msk.f32.vlgmr.msra.gmra.mrb[6].mxu1 %vm189_vm3, %v725_v24 }
 0x864   :  { %2283 = vmatmul.mubr.msk.f32.vlgmr.msra.gmra.mrb[8].mxu0 %vm307_vm4, %v731_v25  ;;  %2508 = vmatpush3.bf16.msra.mxu1 %v2962_v35 }
 0x865   :  { %2509 = vmatprep.subr.bf16.mxu1 %v2811_v1  ;;  %2520 = vmatpush3.bf16.msra.mxu0 %v2906_v6 }
 0x866   :  { %2521 = vmatprep.subr.bf16.mxu0 %v2811_v1  ;;  %2312 = vmatprep.mubr.msk.f32.mxu1 %vm2812_vm0, %v2813_v2 }
 0x867   :  { %2323 = vmatprep.mubr.msk.f32.mxu0 %vm2812_vm0, %v2813_v2 }
 0x868   :  { %2511 = vmatpush3.bf16.msra.mxu1 %v2974_v39 }
 0x869   :  { %2512 = vmatprep.subr.bf16.mxu1 %v2811_v1  ;;  %2523 = vmatpush3.bf16.msra.mxu0 %v2917_v11 }
 0x86a   :  { %2524 = vmatprep.subr.bf16.mxu0 %v2811_v1 }
 0x86c   :  { %2514 = vmatpush3.bf16.msra.mxu1 %v2988_v42 }
 0x86d   :  { %2515 = vmatprep.subr.bf16.mxu1 %v2811_v1 }
 0x870   :  { %2517 = vmatpush3.bf16.msra.mxu1 %v2999_v46 }
 0x871   :  { %2536 = vmatprep.subr.bf16.mxu1 %v2811_v1 }
 0x936   :  { %v897_v26 = vpop.f32.mrb[6].mxu1 }
 0x937   :  { %v902_v27 = vrot.slane %v897_v26, 4  ;;  %v801_v28 = vpop.f32.mrb[8].mxu0  ;;  %v2295_v29 = vpop.f32.mrb[7].mxu1 }
 0x938   :  { %v802_v30 = vadd.f32 %v3035_v55, %v801_v28  ;;  %v2284_v31 = vpop.f32.mrb[9].mxu0 }
 0x939   :  { %v904_v32 = vadd.f32 %v902_v27, %v3080_v44 }
 0x93a   :  { %2648 = vtanh.f32 %v802_v30  ;;  %v2042_v36 = vmul.f32 -1.442695, %v802_v30 }
 0x93b   :  { %2650 = vtanh.f32 %v904_v32  ;;  %v2044_v37 = vmul.f32 -1.442695, %v904_v32 }
 0x93c   :  { %2652 = vpow2.f32 %v2042_v36 }
 0x93d   :  { %2654 = vpow2.f32 %v2044_v37 }
 0x944   :  { %v2649_v33 = vpop.eup %2648 }
 0x945   :  { %v2651_v34 = vpop.eup %2650  ;;  %814 = vrot.lane.b32.xlu0 %v2649_v33, %s2814_s26 }
 0x946   :  { %917 = vrot.lane.b32.xlu1 %v2651_v34, %s2814_s26  ;;  %v2653_v38 = vpop.eup %2652 }
 0x947   :  { %v2655_v40 = vpop.eup %2654  ;;  %v808_v41 = vadd.f32 1.0, %v2653_v38 }
 0x948   :  { %v908_v43 = vadd.f32 1.0, %v2655_v40 }
 0x949   :  { %2656 = vrcp.f32 %v808_v41 }
 0x94a   :  { %2658 = vrcp.f32 %v908_v43 }
 0x953   :  { %v2657_v45 = vpop.eup %2656 }
 0x954   :  { %v2659_v47 = vpop.eup %2658  ;;  %v812_v54 = vmul.f32 %v2657_v45, %v3090_v15  ;;  %v3159_v15 = vadd.f32 %v2938_v14, %v3011_v51 }
 0x955   :  { %v915_v57 = vmul.f32 %v2659_v47, %v913_v53 }
 0x9b7   :  { %v815_v44 = vpop.permute.xlu0 %814 }
 0x9b8   :  { %v817_v48 = vmul.f32 %v2657_v45, %v815_v44  ;;  %v918_v49 = vpop.permute.xlu1 %917 }
 0x9b9   :  { %v920_v52 = vmul.f32 %v2659_v47, %v918_v49 }
 0x9ba   :  { %819 = vrot.lane.b32.xlu0 %v817_v48, %s2815_s29 }
 0x9bb   :  { %922 = vrot.lane.b32.xlu1 %v920_v52, %s2815_s29 }
 0xa2c   :  { %v820_v56 = vpop.permute.xlu0 %819 }
 0xa2d   :  { %v3127_v58 = vadd.f32 %v820_v56, %v812_v54  ;;  %v923_v13 = vpop.permute.xlu1 %922 }
 0xa2e   :  { %v3129_v59 = vadd.f32 %v923_v13, %v915_v57 }
 0xa2f   :  { %2660 = vtanh.f32 %v3127_v58 }
 0xa30   :  { %2662 = vtanh.f32 %v3129_v59  ;;  %v1124_v36 = vrot.slane %v3129_v59, 4 }
 0xa39   :  { %v2661_v60 = vpop.eup %2660 }
 0xa3a   :  { %v2663_v61 = vpop.eup %2662  ;;  %825 = vrot.lane.b32.xlu0 %v2661_v60, %s2814_s26 }
 0xa3b   :  { %928 = vrot.lane.b32.xlu1 %v2663_v61, %s2814_s26 }
 0xaac   :  { %v826_v62 = vpop.permute.xlu0 %825 }
 0xaad   :  { %v828_v63 = vmul.f32 %v2657_v45, %v826_v62  ;;  %v929_v0 = vpop.permute.xlu1 %928 }
 0xaae   :  { %v931_v3 = vmul.f32 %v2659_v47, %v929_v0 }
 0xaaf   :  { %v937_v4 = vrot.slane %v828_v63, 4 }
 0xab0   :  { %933 = vrot.lane.b32.xlu0 %v931_v3, %s2815_s29  ;;  %v1040_v5 = vrot.slane %v931_v3, 4 }
 0xab1   :  { %938 = vrot.lane.b32.xlu1 %v937_v4, %s2814_s26 }
 0xab4   :  { %1041 = vrot.lane.b32.xlu0 %v1040_v5, %s2815_s29 }
 0xb22   :  { %v934_v7 = vpop.permute.xlu0 %933 }
 0xb23   :  { %v939_v8 = vpop.permute.xlu1 %938 }
 0xb24   :  { %v941_v9 = vsel %vm189_vm3, %v934_v7, %v939_v8 }
 0xb25   :  { %v943_v10 = vrot.slane %v941_v9, 4 }
 0xb26   :  { %v1042_v12 = vpop.permute.xlu0 %1041 }
 0xb27   :  { %2313 = vmatmul.mubr.msk.f32.vlgmr.msra.gmra.mrb[8].mxu1 %vm307_vm4, %v943_v10  ;;  %2324 = vmatmul.mubr.msk.f32.vlgmr.msra.gmra.mrb[10].mxu0 %vm189_vm3, %v1042_v12 }
 0xb28   :  { %2526 = vmatpush3.bf16.msra.mxu0 %v2962_v35  ;;  %2538 = vmatpush3.bf16.msra.mxu1 %v2906_v6 }
 0xb29   :  { %2527 = vmatprep.subr.bf16.mxu0 %v2811_v1  ;;  %2539 = vmatprep.subr.bf16.mxu1 %v2811_v1 }
 0xb2a   :  { %2353 = vmatprep.mubr.msk.f32.mxu1 %vm2812_vm0, %v2813_v2  ;;  %2342 = vmatprep.mubr.msk.f32.mxu0 %vm2812_vm0, %v2813_v2 }
 0xb2c   :  { %2529 = vmatpush3.bf16.msra.mxu0 %v2974_v39  ;;  %2541 = vmatpush3.bf16.msra.mxu1 %v2917_v11 }
 0xb2d   :  { %2530 = vmatprep.subr.bf16.mxu0 %v2811_v1  ;;  %2542 = vmatprep.subr.bf16.mxu1 %v2811_v1 }
 0xb30   :  { %2532 = vmatpush3.bf16.msra.mxu0 %v2988_v42 }
 0xb31   :  { %2533 = vmatprep.subr.bf16.mxu0 %v2811_v1 }
 0xb34   :  { %2535 = vmatpush3.bf16.msra.mxu0 %v2999_v46 }
 0xb35   :  { %2554 = vmatprep.subr.bf16.mxu0 %v2811_v1 }
 0xbfa   :  { %v1012_v16 = vpop.f32.mrb[8].mxu1  ;;  %v1111_v17 = vpop.f32.mrb[10].mxu0 }
 0xbfb   :  { %v1013_v18 = vadd.f32 %v3035_v55, %v1012_v16  ;;  %v1115_v19 = vadd.f32 %v1111_v17, %v3159_v15  ;;  %v2314_v20 = vpop.f32.mrb[9].mxu1  ;;  %v2325_v21 = vpop.f32.mrb[11].mxu0 }
 0xbfd   :  { %2664 = vtanh.f32 %v1013_v18  ;;  %v2046_v24 = vmul.f32 -1.442695, %v1013_v18  ;;  %v2048_v25 = vmul.f32 -1.442695, %v1115_v19 }
 0xbfe   :  { %2666 = vtanh.f32 %v1115_v19 }
 0xbff   :  { %2668 = vpow2.f32 %v2046_v24 }
 0xc00   :  { %2670 = vpow2.f32 %v2048_v25 }
 0xc07   :  { %v2665_v22 = vpop.eup %2664 }
 0xc08   :  { %v2667_v23 = vpop.eup %2666  ;;  %1025 = vrot.lane.b32.xlu1 %v2665_v22, %s2814_s26 }
 0xc09   :  { %1128 = vrot.lane.b32.xlu0 %v2667_v23, %s2814_s26  ;;  %v2669_v51 = vpop.eup %2668 }
 0xc0a   :  { %v2671_v26 = vpop.eup %2670  ;;  %v1019_v27 = vadd.f32 1.0, %v2669_v51 }
 0xc0b   :  { %v1119_v28 = vadd.f32 1.0, %v2671_v26 }
 0xc0c   :  { %2672 = vrcp.f32 %v1019_v27 }
 0xc0d   :  { %2674 = vrcp.f32 %v1119_v28 }
 0xc16   :  { %v2673_v29 = vpop.eup %2672 }
 0xc17   :  { %v2675_v31 = vpop.eup %2674  ;;  %v1023_v37 = vmul.f32 %v2673_v29, %v3127_v58 }
 0xc18   :  { %v1126_v38 = vmul.f32 %v2675_v31, %v1124_v36 }
 0xc7a   :  { %v1026_v30 = vpop.permute.xlu1 %1025 }
 0xc7b   :  { %v1129_v32 = vpop.permute.xlu0 %1128  ;;  %v1028_v33 = vmul.f32 %v2673_v29, %v1026_v30 }
 0xc7c   :  { %v1131_v34 = vmul.f32 %v2675_v31, %v1129_v32 }
 0xc7d   :  { %1030 = vrot.lane.b32.xlu1 %v1028_v33, %s2815_s29 }
 0xc7e   :  { %1133 = vrot.lane.b32.xlu0 %v1131_v34, %s2815_s29 }
 0xcef   :  { %v1031_v40 = vpop.permute.xlu1 %1030 }
 0xcf0   :  { %v1134_v41 = vpop.permute.xlu0 %1133  ;;  %v3169_v43 = vadd.f32 %v1031_v40, %v1023_v37 }
 0xcf1   :  { %v3171_v45 = vadd.f32 %v1134_v41, %v1126_v38 }
 0xcf2   :  { %2676 = vtanh.f32 %v3169_v43 }
 0xcf3   :  { %2678 = vtanh.f32 %v3171_v45  ;;  %v1333_v20 = vrot.slane %v3171_v45, 4 }
 0xcfc   :  { %v2677_v44 = vpop.eup %2676 }
 0xcfd   :  { %v2679_v47 = vpop.eup %2678  ;;  %1036 = vrot.lane.b32.xlu1 %v2677_v44, %s2814_s26 }
 0xcfe   :  { %1139 = vrot.lane.b32.xlu0 %v2679_v47, %s2814_s26 }
 0xd6f   :  { %v1037_v48 = vpop.permute.xlu1 %1036 }
 0xd70   :  { %v1140_v49 = vpop.permute.xlu0 %1139  ;;  %v1039_v52 = vmul.f32 %v2673_v29, %v1037_v48 }
 0xd71   :  { %v1142_v53 = vmul.f32 %v2675_v31, %v1140_v49 }
 0xd72   :  { %1148 = vrot.lane.b32.xlu0 %v1039_v52, %s2814_s26 }
 0xd73   :  { %1144 = vrot.lane.b32.xlu1 %v1142_v53, %s2815_s29 }
 0xde4   :  { %v1149_v54 = vpop.permute.xlu0 %1148 }
 0xde5   :  { %v1145_v56 = vpop.permute.xlu1 %1144 }
 0xde6   :  { %v1151_v57 = vsel %vm189_vm3, %v1145_v56, %v1149_v54  ;;  %2354 = vmatmul.mubr.msk.f32.vlgmr.msra.gmra.mrb[10].mxu1 %vm189_vm3, %v1145_v56 }
 0xde7   :  { %2343 = vmatmul.mubr.msk.f32.vlgmr.msra.gmra.mrb[12].mxu0 %vm307_vm4, %v1151_v57  ;;  %2544 = vmatpush3.bf16.msra.mxu1 %v2962_v35 }
 0xde8   :  { %2545 = vmatprep.subr.bf16.mxu1 %v2811_v1  ;;  %2556 = vmatpush3.bf16.msra.mxu0 %v2906_v6 }
 0xde9   :  { %2557 = vmatprep.subr.bf16.mxu0 %v2811_v1  ;;  %2372 = vmatprep.mubr.msk.f32.mxu1 %vm2812_vm0, %v2813_v2 }
 0xdea   :  { %2383 = vmatprep.mubr.msk.f32.mxu0 %vm2812_vm0, %v2813_v2 }
 0xdeb   :  { %2547 = vmatpush3.bf16.msra.mxu1 %v2974_v39 }
 0xdec   :  { %2548 = vmatprep.subr.bf16.mxu1 %v2811_v1  ;;  %2559 = vmatpush3.bf16.msra.mxu0 %v2917_v11 }
 0xded   :  { %2560 = vmatprep.subr.bf16.mxu0 %v2811_v1 }
 0xdef   :  { %2550 = vmatpush3.bf16.msra.mxu1 %v2988_v42 }
 0xdf0   :  { %2551 = vmatprep.subr.bf16.mxu1 %v2811_v1 }
 0xdf3   :  { %2553 = vmatpush3.bf16.msra.mxu1 %v2999_v46 }
 0xdf4   :  { %2572 = vmatprep.subr.bf16.mxu1 %v2811_v1 }
 0xeb9   :  { %v1317_v58 = vpop.f32.mrb[10].mxu1 }
 0xeba   :  { %v1322_v13 = vrot.slane %v1317_v58, 4  ;;  %v1221_v59 = vpop.f32.mrb[12].mxu0  ;;  %v2355_v60 = vpop.f32.mrb[11].mxu1 }
 0xebb   :  { %v1222_v61 = vadd.f32 %v3035_v55, %v1221_v59  ;;  %v2344_v62 = vpop.f32.mrb[13].mxu0 }
 0xebc   :  { %v1324_v63 = vadd.f32 %v1322_v13, %v3159_v15 }
 0xebd   :  { %2680 = vtanh.f32 %v1222_v61  ;;  %v2050_v4 = vmul.f32 -1.442695, %v1222_v61 }
 0xebe   :  { %2682 = vtanh.f32 %v1324_v63  ;;  %v2052_v5 = vmul.f32 -1.442695, %v1324_v63 }
 0xebf   :  { %2684 = vpow2.f32 %v2050_v4 }
 0xec0   :  { %2686 = vpow2.f32 %v2052_v5 }
 0xec7   :  { %v2681_v0 = vpop.eup %2680 }
 0xec8   :  { %v2683_v3 = vpop.eup %2682  ;;  %1234 = vrot.lane.b32.xlu1 %v2681_v0, %s2814_s26 }
 0xec9   :  { %1337 = vrot.lane.b32.xlu0 %v2683_v3, %s2814_s26  ;;  %v2685_v7 = vpop.eup %2684 }
 0xeca   :  { %v2687_v8 = vpop.eup %2686  ;;  %v1228_v9 = vadd.f32 1.0, %v2685_v7 }
 0xecb   :  { %v1328_v10 = vadd.f32 1.0, %v2687_v8 }
 0xecc   :  { %2688 = vrcp.f32 %v1228_v9 }
 0xecd   :  { %2690 = vrcp.f32 %v1328_v10 }
 0xed6   :  { %v2689_v12 = vpop.eup %2688 }
 0xed7   :  { %v2691_v16 = vpop.eup %2690  ;;  %v1232_v21 = vmul.f32 %v2689_v12, %v3169_v43 }
 0xed8   :  { %v1335_v23 = vmul.f32 %v2691_v16, %v1333_v20 }
 0xf3a   :  { %v1235_v15 = vpop.permute.xlu1 %1234 }
 0xf3b   :  { %v1237_v17 = vmul.f32 %v2689_v12, %v1235_v15  ;;  %v1338_v18 = vpop.permute.xlu0 %1337 }
 0xf3c   :  { %v1340_v19 = vmul.f32 %v2691_v16, %v1338_v18 }
 0xf3d   :  { %1239 = vrot.lane.b32.xlu1 %v1237_v17, %s2815_s29 }
 0xf3e   :  { %1342 = vrot.lane.b32.xlu0 %v1340_v19, %s2815_s29 }
 0xfaf   :  { %v1240_v22 = vpop.permute.xlu1 %1239 }
 0xfb0   :  { %v3206_v24 = vadd.f32 %v1240_v22, %v1232_v21  ;;  %v1343_v25 = vpop.permute.xlu0 %1342 }
 0xfb1   :  { %v3208_v51 = vadd.f32 %v1343_v25, %v1335_v23 }
 0xfb2   :  { %2692 = vtanh.f32 %v3206_v24 }
 0xfb3   :  { %2694 = vtanh.f32 %v3208_v51  ;;  %v1544_v62 = vrot.slane %v3208_v51, 4 }
 0xfbc   :  { %v2693_v26 = vpop.eup %2692 }
 0xfbd   :  { %v2695_v27 = vpop.eup %2694  ;;  %1245 = vrot.lane.b32.xlu1 %v2693_v26, %s2814_s26 }
 0xfbe   :  { %1348 = vrot.lane.b32.xlu0 %v2695_v27, %s2814_s26 }
0x102f   :  { %v1246_v28 = vpop.permute.xlu1 %1245 }
0x1030   :  { %v1248_v29 = vmul.f32 %v2689_v12, %v1246_v28  ;;  %v1349_v30 = vpop.permute.xlu0 %1348 }
0x1031   :  { %v1351_v31 = vmul.f32 %v2691_v16, %v1349_v30 }
0x1032   :  { %v1357_v32 = vrot.slane %v1248_v29, 4 }
0x1033   :  { %1353 = vrot.lane.b32.xlu1 %v1351_v31, %s2815_s29  ;;  %v1460_v33 = vrot.slane %v1351_v31, 4 }
0x1034   :  { %1358 = vrot.lane.b32.xlu0 %v1357_v32, %s2814_s26 }
0x1037   :  { %1461 = vrot.lane.b32.xlu1 %v1460_v33, %s2815_s29 }
0x10a5   :  { %v1354_v34 = vpop.permute.xlu1 %1353 }
0x10a6   :  { %v1359_v36 = vpop.permute.xlu0 %1358 }
0x10a7   :  { %v1361_v37 = vsel %vm189_vm3, %v1354_v34, %v1359_v36 }
0x10a8   :  { %v1363_v38 = vrot.slane %v1361_v37, 4 }
0x10a9   :  { %v1462_v40 = vpop.permute.xlu1 %1461 }
0x10aa   :  { %2373 = vmatmul.mubr.msk.f32.vlgmr.msra.gmra.mrb[12].mxu1 %vm307_vm4, %v1363_v38  ;;  %2384 = vmatmul.mubr.msk.f32.vlgmr.msra.gmra.mrb[14].mxu0 %vm189_vm3, %v1462_v40 }
0x10ab   :  { %2562 = vmatpush3.bf16.msra.mxu0 %v2962_v35  ;;  %2574 = vmatpush3.bf16.msra.mxu1 %v2906_v6  ;;  %v3238_v6 = vadd.f32 %v3009_v50, %v2938_v14 }
0x10ac   :  { %2563 = vmatprep.subr.bf16.mxu0 %v2811_v1  ;;  %2575 = vmatprep.subr.bf16.mxu1 %v2811_v1 }
0x10ad   :  { %2413 = vmatprep.mubr.msk.f32.mxu1 %vm2812_vm0, %v2813_v2  ;;  %2402 = vmatprep.mubr.msk.f32.mxu0 %vm2812_vm0, %v2813_v2 }
0x10af   :  { %2565 = vmatpush3.bf16.msra.mxu0 %v2974_v39  ;;  %2577 = vmatpush3.bf16.msra.mxu1 %v2917_v11 }
0x10b0   :  { %2566 = vmatprep.subr.bf16.mxu0 %v2811_v1  ;;  %2578 = vmatprep.subr.bf16.mxu1 %v2811_v1 }
0x10b3   :  { %2568 = vmatpush3.bf16.msra.mxu0 %v2988_v42 }
0x10b4   :  { %2569 = vmatprep.subr.bf16.mxu0 %v2811_v1 }
0x10b7   :  { %2571 = vmatpush3.bf16.msra.mxu0 %v2999_v46 }
0x10b8   :  { %2590 = vmatprep.subr.bf16.mxu0 %v2811_v1 }
0x117d   :  { %v1432_v41 = vpop.f32.mrb[12].mxu1  ;;  %v1531_v43 = vpop.f32.mrb[14].mxu0 }
0x117e   :  { %v1433_v11 = vadd.f32 %v3035_v55, %v1432_v41  ;;  %v1535_v45 = vadd.f32 %v1531_v43, %v3238_v6  ;;  %v2374_v44 = vpop.f32.mrb[13].mxu1  ;;  %v2385_v47 = vpop.f32.mrb[15].mxu0 }
0x1180   :  { %2696 = vtanh.f32 %v1433_v11  ;;  %v2054_v52 = vmul.f32 -1.442695, %v1433_v11  ;;  %v2056_v53 = vmul.f32 -1.442695, %v1535_v45 }
0x1181   :  { %2698 = vtanh.f32 %v1535_v45 }
0x1182   :  { %2700 = vpow2.f32 %v2054_v52 }
0x1183   :  { %2702 = vpow2.f32 %v2056_v53 }
0x118a   :  { %v2697_v48 = vpop.eup %2696 }
0x118b   :  { %v2699_v49 = vpop.eup %2698  ;;  %1445 = vrot.lane.b32.xlu0 %v2697_v48, %s2814_s26 }
0x118c   :  { %1548 = vrot.lane.b32.xlu1 %v2699_v49, %s2814_s26  ;;  %v2701_v14 = vpop.eup %2700 }
0x118d   :  { %v2703_v50 = vpop.eup %2702  ;;  %v1439_v54 = vadd.f32 1.0, %v2701_v14 }
0x118e   :  { %v1539_v56 = vadd.f32 1.0, %v2703_v50 }
0x118f   :  { %2704 = vrcp.f32 %v1439_v54 }
0x1190   :  { %2706 = vrcp.f32 %v1539_v56 }
0x1199   :  { %v2705_v57 = vpop.eup %2704 }
0x119a   :  { %v2707_v13 = vpop.eup %2706  ;;  %v1443_v63 = vmul.f32 %v2705_v57, %v3206_v24 }
0x119b   :  { %v1546_v0 = vmul.f32 %v2707_v13, %v1544_v62 }
0x11fd   :  { %v1446_v58 = vpop.permute.xlu0 %1445 }
0x11fe   :  { %v1549_v59 = vpop.permute.xlu1 %1548  ;;  %v1448_v60 = vmul.f32 %v2705_v57, %v1446_v58 }
0x11ff   :  { %v1551_v61 = vmul.f32 %v2707_v13, %v1549_v59 }
0x1200   :  { %1450 = vrot.lane.b32.xlu0 %v1448_v60, %s2815_s29 }
0x1201   :  { %1553 = vrot.lane.b32.xlu1 %v1551_v61, %s2815_s29 }
0x1272   :  { %v1451_v3 = vpop.permute.xlu0 %1450 }
0x1273   :  { %v1554_v4 = vpop.permute.xlu1 %1553  ;;  %v1453_v5 = vadd.f32 %v1451_v3, %v1443_v63 }
0x1274   :  { %v1556_v7 = vadd.f32 %v1554_v4, %v1546_v0 }
0x1275   :  { %2708 = vtanh.f32 %v1453_v5 }
0x1276   :  { %2710 = vtanh.f32 %v1556_v7  ;;  %v1753_v36 = vrot.slane %v1556_v7, 4  ;;  %v1881_v7 = vld [vmem:[%s3338_s8 + $0x8] sm:$0xff] }
0x127f   :  { %v2709_v8 = vpop.eup %2708 }
0x1280   :  { %v2711_v9 = vpop.eup %2710  ;;  %1456 = vrot.lane.b32.xlu0 %v2709_v8, %s2814_s26  ;;  %v1882_v8 = vld [vmem:[%s3338_s8 + $0x10] sm:$0xff] }
0x1281   :  { %1559 = vrot.lane.b32.xlu1 %v2711_v9, %s2814_s26 }
0x12f2   :  { %v1457_v10 = vpop.permute.xlu0 %1456 }
0x12f3   :  { %v1560_v12 = vpop.permute.xlu1 %1559  ;;  %v1459_v15 = vmul.f32 %v2705_v57, %v1457_v10  ;;  %v1883_v10 = vld [vmem:[%s3338_s8 + $0x18] sm:$0xff] }
0x12f4   :  { %v1562_v16 = vmul.f32 %v2707_v13, %v1560_v12  ;;  %v2594_v12 = vpack.c.bf16 %v1883_v10, %v1882_v8 }
0x12f5   :  { %1568 = vrot.lane.b32.xlu1 %v1459_v15, %s2814_s26 }
0x12f6   :  { %1564 = vrot.lane.b32.xlu0 %v1562_v16, %s2815_s29 }
0x1367   :  { %v1569_v17 = vpop.permute.xlu1 %1568 }
0x1368   :  { %v1565_v18 = vpop.permute.xlu0 %1564 }
0x1369   :  { %v1571_v19 = vsel %vm189_vm3, %v1565_v18, %v1569_v17  ;;  %2414 = vmatmul.mubr.msk.f32.vlgmr.msra.gmra.mrb[14].mxu1 %vm189_vm3, %v1565_v18 }
0x136a   :  { %2403 = vmatmul.mubr.msk.f32.vlgmr.msra.gmra.mrb[16].mxu0 %vm307_vm4, %v1571_v19  ;;  %2580 = vmatpush3.bf16.msra.mxu1 %v2962_v35 }
0x136b   :  { %2581 = vmatprep.subr.bf16.mxu1 %v2811_v1  ;;  %2432 = vmatprep.mubr.msk.f32.mxu1 %vm2812_vm0, %v2813_v2 }
0x136c   :  { %2443 = vmatprep.mubr.msk.f32.mxu0 %vm2812_vm0, %v2813_v2 }
0x136e   :  { %2583 = vmatpush3.bf16.msra.mxu1 %v2974_v39 }
0x136f   :  { %2584 = vmatprep.subr.bf16.mxu1 %v2811_v1 }
0x1372   :  { %2586 = vmatpush3.bf16.msra.mxu1 %v2988_v42 }
0x1373   :  { %2587 = vmatprep.subr.bf16.mxu1 %v2811_v1 }
0x1376   :  { %2589 = vmatpush3.bf16.msra.mxu1 %v2999_v46 }
0x143c   :  { %v1737_v20 = vpop.f32.mrb[14].mxu1 }
0x143d   :  { %v1742_v35 = vrot.slane %v1737_v20, 4  ;;  %v1641_v21 = vpop.f32.mrb[16].mxu0  ;;  %v2415_v22 = vpop.f32.mrb[15].mxu1 }
0x143e   :  { %v1642_v23 = vadd.f32 %v3035_v55, %v1641_v21  ;;  %v2404_v24 = vpop.f32.mrb[17].mxu0 }
0x143f   :  { %v1744_v25 = vadd.f32 %v1742_v35, %v3238_v6 }
0x1440   :  { %2712 = vtanh.f32 %v1642_v23  ;;  %v2058_v42 = vmul.f32 -1.442695, %v1642_v23 }
0x1441   :  { %2714 = vtanh.f32 %v1744_v25  ;;  %v2060_v51 = vmul.f32 -1.442695, %v1744_v25 }
0x1442   :  { %2716 = vpow2.f32 %v2058_v42 }
0x1443   :  { %2718 = vpow2.f32 %v2060_v51 }
0x144a   :  { %v2713_v2 = vpop.eup %2712 }
0x144b   :  { %v2715_v39 = vpop.eup %2714  ;;  %1654 = vrot.lane.b32.xlu0 %v2713_v2, %s2814_s26 }
0x144c   :  { %1757 = vrot.lane.b32.xlu1 %v2715_v39, %s2814_s26  ;;  %v2717_v46 = vpop.eup %2716 }
0x144d   :  { %v2719_v26 = vpop.eup %2718  ;;  %v1648_v27 = vadd.f32 1.0, %v2717_v46 }
0x144e   :  { %v1748_v28 = vadd.f32 1.0, %v2719_v26 }
0x144f   :  { %2720 = vrcp.f32 %v1648_v27 }
0x1450   :  { %2722 = vrcp.f32 %v1748_v28 }
0x1459   :  { %v2721_v29 = vpop.eup %2720 }
0x145a   :  { %v2723_v31 = vpop.eup %2722  ;;  %v1652_v37 = vmul.f32 %v2721_v29, %v1453_v5 }
0x145b   :  { %v1755_v40 = vmul.f32 %v2723_v31, %v1753_v36 }
0x14bd   :  { %v1655_v30 = vpop.permute.xlu0 %1654 }
0x14be   :  { %v1657_v32 = vmul.f32 %v2721_v29, %v1655_v30  ;;  %v1758_v33 = vpop.permute.xlu1 %1757 }
0x14bf   :  { %v1760_v34 = vmul.f32 %v2723_v31, %v1758_v33 }
0x14c0   :  { %1659 = vrot.lane.b32.xlu0 %v1657_v32, %s2815_s29 }
0x14c1   :  { %1762 = vrot.lane.b32.xlu1 %v1760_v34, %s2815_s29 }
0x1532   :  { %v1660_v38 = vpop.permute.xlu0 %1659 }
0x1533   :  { %v1662_v6 = vadd.f32 %v1660_v38, %v1652_v37  ;;  %v1763_v41 = vpop.permute.xlu1 %1762 }
0x1534   :  { %v1765_v43 = vadd.f32 %v1763_v41, %v1755_v40 }
0x1535   :  { %2724 = vtanh.f32 %v1662_v6 }
0x1536   :  { %2726 = vtanh.f32 %v1765_v43 }
0x153f   :  { %v2725_v11 = vpop.eup %2724 }
0x1540   :  { %v2727_v45 = vpop.eup %2726  ;;  %1665 = vrot.lane.b32.xlu0 %v2725_v11, %s2814_s26 }
0x1541   :  { %1768 = vrot.lane.b32.xlu1 %v2727_v45, %s2814_s26 }
0x15b2   :  { %v1666_v44 = vpop.permute.xlu0 %1665 }
0x15b3   :  { %v1668_v47 = vmul.f32 %v2721_v29, %v1666_v44  ;;  %v1769_v48 = vpop.permute.xlu1 %1768 }
0x15b4   :  { %v1771_v49 = vmul.f32 %v2723_v31, %v1769_v48 }
0x15b5   :  { %v1777_v52 = vrot.slane %v1668_v47, 4 }
0x15b6   :  { %1773 = vrot.lane.b32.xlu0 %v1771_v49, %s2815_s29 }
0x15b7   :  { %1778 = vrot.lane.b32.xlu1 %v1777_v52, %s2814_s26 }
0x1628   :  { %v1774_v53 = vpop.permute.xlu0 %1773 }
0x1629   :  { %1969 = vst.msk [vmem:[#allocation6 - $0x4] sm:$0xf0] %vm1968_vm5, %v1774_v53  ;;  %v1779_v14 = vpop.permute.xlu1 %1778 }
0x162a   :  { %v1781_v50 = vsel %vm189_vm3, %v1774_v53, %v1779_v14 }
0x162b   :  { %v1783_v54 = vrot.slane %v1781_v50, 4 }
0x162d   :  { %2433 = vmatmul.mubr.msk.f32.vlgmr.msra.gmra.mrb[16].mxu1 %vm307_vm4, %v1783_v54 }
0x1700   :  { %v1852_v56 = vpop.f32.mrb[16].mxu1 }
0x1701   :  { %v1853_v57 = vadd.f32 %v3035_v55, %v1852_v56  ;;  %v2434_v58 = vpop.f32.mrb[17].mxu1  ;;  %v1880_v55 = vld [vmem:[%s3338_s8] sm:$0xff]  ;;  %s2817_s8 = smov [#allocation6]  }
0x1702   :  { %v2591_v9 = vpack.c.bf16 %v1881_v7, %v1880_v55  ;;  %s1992_s4 = sshll.u32 %s2817_s8, 4  ;;  %s1993_s4 = int_to_ptr.vmem [resolvable:$true] %s1992_s4 }
0x1703   :  { %2728 = vtanh.f32 %v1853_v57  ;;  %v2062_v59 = vmul.f32 -1.442695, %v1853_v57  ;;  %s2758_s22 = scalar_lea.vmem %s1993_s4, 128  ;;  %p2763_p9 = scmp.lt.s32.totalorder %s1993_s4, %s1993_s4 }
0x1704   :  { %2592 = vmatpush3.bf16.msra.mxu0 %v2591_v9  ;;  %p2759_p8 = scmp.ne.s32.totalorder %s1993_s4, %s2758_s22  ;;  %p2764_p10 = scmp.lt.s32.totalorder %s2758_s22, %s2758_s22 }
0x1705   :  { %2730 = vpow2.f32 %v2062_v59  ;;  %2593 = vmatprep.subr.bf16.mxu0 %v2811_v1 }
0x1706   :  { %p2765_p11 = por %p2764_p10, %p2763_p9 }
0x1708   :  { %2595 = vmatpush3.bf16.msra.mxu0 %v2594_v12  ;;  %p2766_p12 = pnand %p2765_p11, %p2759_p8 }
0x170d   :  { %v2729_v13 = vpop.eup %2728 }
0x170e   :  { %1865 = vrot.lane.b32.xlu0 %v2729_v13, %s2814_s26 }
0x170f   :  { %v2731_v60 = vpop.eup %2730 }
0x1710   :  { %v1859_v61 = vadd.f32 1.0, %v2731_v60 }
0x1712   :  { %2732 = vrcp.f32 %v1859_v61 }
0x171c   :  { %v2733_v62 = vpop.eup %2732 }
0x171d   :  { %v1863_v3 = vmul.f32 %v2733_v62, %v1662_v6 }
0x1780   :  { %v1866_v63 = vpop.permute.xlu0 %1865 }
0x1781   :  { %v1868_v0 = vmul.f32 %v2733_v62, %v1866_v63 }
0x1783   :  { %1870 = vrot.lane.b32.xlu1 %v1868_v0, %s2815_s29 }
0x17f5   :  { %v1871_v4 = vpop.permute.xlu1 %1870 }
0x17f6   :  { %v1873_v5 = vadd.f32 %v1871_v4, %v1863_v3 }
0x17f8   :  { %2734 = vtanh.f32 %v1873_v5 }
0x1802   :  { %v2735_v15 = vpop.eup %2734 }
0x1803   :  { %1876 = vrot.lane.b32.xlu0 %v2735_v15, %s2814_s26 }
0x1807   :  { %1975 = vrot.lane.b32.xlu0 %v1765_v43, %s2816_s19 }
0x1875   :  { %v1877_v16 = vpop.permute.xlu0 %1876 }
0x1876   :  { %v1879_v17 = vmul.f32 %v2733_v62, %v1877_v16 }
0x1878   :  { %1892 = vrot.lane.b32.xlu1 %v1879_v17, %s2815_s29 }
0x1879   :  { %v1976_v18 = vpop.permute.xlu0 %1975 }
0x187a   :  { %1978 = vst.msk [vmem:[#allocation7 - $0x4] sm:$0xf0] %vm1968_vm5, %v1976_v18 }
0x187c   :  { %1980 = vrot.lane.b32.xlu1 %v1873_v5, %s2816_s19 }
0x18ea   :  { %v1893_v19 = vpop.permute.xlu1 %1892 }
0x18eb   :  { %1973 = vst.msk [vmem:[#allocation6 + $0x4] sm:$0xf] %vm1972_vm6, %v1893_v19  ;;  %2444 = vmatmul.mubr.msk.f32.vlgmr.msra.gmra.mrb[18].mxu0 %vm189_vm3, %v1893_v19 }
0x18ee   :  { %v1981_v1 = vpop.permute.xlu1 %1980 }
0x18ef   :  { %1984 = vst.msk [vmem:[#allocation7 + $0x4] sm:$0xf] %vm1972_vm6, %v1981_v1 }
0x18f0   :  { %2769 = shalt.err (!%p2766_p12)
}
0x18f1   :  { %s2770_s23 = scalar_lea.hbm %s3341_s11, 128 }
0x18f2   :  { %p2771_p13 = scmp.ne.s32.totalorder %s3341_s11, %s2770_s23  ;;  %p2774_p0 = scmp.lt.u32.totalorder %s2770_s23, %s3341_s11 }
0x18f4   :  { %p2776_p1 = pnand %p2774_p0, %p2771_p13 }
0x18f6   :  { %2779 = shalt.err (!%p2776_p1)
}
0x18f7   :  { %s2819_s28 = smov 4   ;;  %s2780_s6 = scalar_lea.vmem %s2005_s21, 128 }
0x18f8   :  { %1998 = dma.vmem_to_hbm [thread:$0]  %s1993_s4, 128, %s3341_s11, [#allocation5], %s2814_s26, %s2814_s26, %s2819_s28  }
0x18f9   :  { %p2781_p2 = scmp.ne.s32.totalorder %s2005_s21, %s2780_s6  ;;  %p2785_p3 = scmp.lt.s32.totalorder %s2005_s21, %s2005_s21 }
0x18fa   :  { %p2786_p4 = scmp.lt.s32.totalorder %s2780_s6, %s2780_s6 }
0x18fc   :  { %p2787_p5 = por %p2786_p4, %p2785_p3 }
0x18fe   :  { %p2788_p6 = pnand %p2787_p5, %p2781_p2 }
0x1900   :  { %2791 = shalt.err (!%p2788_p6)
}
0x1901   :  { %s2792_s2 = scalar_lea.hbm %s3342_s12, 128 }
0x1902   :  { %p2793_p7 = scmp.ne.s32.totalorder %s3342_s12, %s2792_s2  ;;  %p2796_p8 = scmp.lt.u32.totalorder %s2792_s2, %s3342_s12 }
0x1904   :  { %p2798_p9 = pnand %p2796_p8, %p2793_p7 }
0x1906   :  { %2801 = shalt.err (!%p2798_p9)
}
0x1907   :  { %2010 = dma.vmem_to_hbm [thread:$0]  %s2005_s21, 128, %s3342_s12, [#allocation8], %s2814_s26, %s2814_s26, %s2819_s28   ;;  %v2063_v20 = vld [vmem:[#allocation2] ss:$0 sm:$0xff]  ;;  %vm1966_vm7 = vcmask 3072  }
0x19be   :  { %v1962_v35 = vpop.f32.mrb[18].mxu0 }
0x19bf   :  { %v1963_v21 = vadd.f32 %v2063_v20, %v1962_v35  ;;  %v2445_v22 = vpop.f32.mrb[19].mxu0 }
0x19c1   :  { %1967 = vst.msk [vmem:[%s3340_s10] sm:$0xf] %vm1966_vm7, %v1963_v21 }
0x19c2   :  { %2804 = dma.done.wait [#allocation5], 128  }
0x19c3   :  { %2805 = vsyncadd [#allocation5], 4294967168 }
0x19c4   :  { %2806 = dma.done.wait [#allocation8], 128  }
0x19c5   :  { %2807 = vsyncadd [#allocation8], 4294967168 }
0x19c6   :  { %2019 = vsyncpa [#allocation4], 1 }
0x19c7   :  { %2020 = vsyncpa [#allocation5], 1 }
0x19c8   :  { %2021 = vsyncpa [#allocation8], 1 }

</bundles_post_ra>
